<compile_context>
chip_gen: v6e
topology: v6e:2x2x1
jax: 0.10.0
libtpu: 0.0.40
codegen_flags: <defaults>
</compile_context>

<pallas_src>
import functools

import jax
import jax.numpy as jnp
from jax.experimental import pallas as pl
from jax.experimental.pallas import tpu as pltpu


def _round_up(x, m):
    return ((x + m - 1) // m) * m


def _cdiv(a, b):
    return (a + b - 1) // b


def _make_kernel(offs):
    """offs: static row offsets of the 9 conv taps in the flat padded image."""

    def kernel(xc_ref, xh_ref, w1_ref, shift_ref, w2_ref, b2_ref, out_ref,
               xall_ref):
        tb = xc_ref.shape[0]          # rows computed by this grid step
        g = xh_ref.shape[0]           # halo rows (>= 2*(W+2)+2)

        # Assemble current row block + halo into one contiguous f32 scratch so
        # the 9 tap views are simple row-shifted slices (in-kernel "im2col").
        xall_ref[pl.ds(0, tb), :] = xc_ref[...].astype(jnp.float32)
        xall_ref[pl.ds(tb, g), :] = xh_ref[...].astype(jnp.float32)

        # 3x3 conv (BN scale pre-folded into w1) as 9 accumulated MXU matmuls.
        h = jnp.dot(xall_ref[pl.ds(offs[0], tb), :], w1_ref[0],
                    preferred_element_type=jnp.float32)
        for k in range(1, 9):
            h = h + jnp.dot(xall_ref[pl.ds(offs[k], tb), :], w1_ref[k],
                            preferred_element_type=jnp.float32)

        # Folded BN shift + LeakyReLU(slope=0) == ReLU, in f32.
        h = jnp.maximum(h + shift_ref[...], 0.0)

        # 1x1 conv as a bf16 MXU matmul + bias; store bf16 (lane-dense 256).
        o = jnp.dot(h.astype(jnp.bfloat16), w2_ref[...],
                    preferred_element_type=jnp.float32)
        out_ref[...] = (o + b2_ref[...]).astype(out_ref.dtype)

    return kernel


@functools.partial(jax.jit, static_argnames=("num_anchors", "tile_rows"))
def headpose_forward(x_nchw, params, num_anchors=3, tile_rows=2048):
    """x_nchw: (N, C_in, H, W) float32. Returns (N, H*W*num_anchors, 66) f32."""
    N, C_in, H, W = x_nchw.shape
    C_mid = params["w_conv3x3"].shape[0]          # 2 * C_in
    C_out = params["w_conv1x1"].shape[0]          # num_anchors * 66
    Hp, Wp = H + 2, W + 2
    R = N * Hp * Wp                               # flat padded pixel rows

    # ---- glue (single cheap pass): NCHW -> bf16 NHWC, pad H/W by 1, flatten.
    x = jnp.transpose(x_nchw.astype(jnp.bfloat16), (0, 2, 3, 1))   # (N,H,W,C)
    xp = jnp.pad(x, ((0, 0), (1, 1), (1, 1), (0, 0)))              # (N,Hp,Wp,C)
    xf = xp.reshape(R, C_in)

    # ---- fold params into matmul operands (all tiny, VMEM-resident) ----
    # (C_mid, C_in, 3, 3) -> (3,3,C_in,C_mid) -> (9, C_in, C_mid), k = kh*3+kw
    w1 = jnp.transpose(params["w_conv3x3"], (2, 3, 1, 0)).reshape(9, C_in, C_mid)
    inv_std = 1.0 / jnp.sqrt(params["bn_var"] + 1e-5)
    bn_scale = params["bn_gamma"] * inv_std
    w1 = (w1 * bn_scale[None, None, :]).astype(jnp.float32)        # keep f32
    bn_shift = (params["bn_beta"] - params["bn_mean"] * bn_scale
                ).reshape(1, C_mid).astype(jnp.float32)
    w2 = jnp.transpose(params["w_conv1x1"][:, :, 0, 0], (1, 0))
    C_out_pad = _round_up(C_out, 128)             # lane-dense stores (198->256)
    w2_p = jnp.zeros((C_mid, C_out_pad), jnp.bfloat16).at[:, :C_out].set(
        w2.astype(jnp.bfloat16))
    b2_p = jnp.zeros((1, C_out_pad), jnp.float32).at[:, :C_out].set(
        params["b_conv1x1"].reshape(1, C_out).astype(jnp.float32))

    # ---- tiling over flat padded-pixel rows ----
    halo = 2 * Wp + 2                             # deepest tap offset
    g = _round_up(max(halo, 16), 16)              # halo rows, bf16-sublane mult
    # tile rows: multiple of g, aimed at tile_rows, >=2 grid steps if possible.
    tb = _round_up(min(tile_rows, max(g, _cdiv(R, 2))), g)
    nb = _cdiv(R, tb)                             # ragged last block is masked
    hb = tb // g                                  # halo-block stride in g-blocks
    last_halo_blk = (R - 1) // g

    offs = [dy * Wp + dx for dy in range(3) for dx in range(3)]

    out_p = pl.pallas_call(
        _make_kernel(offs),
        out_shape=jax.ShapeDtypeStruct((R, C_out_pad), jnp.bfloat16),
        grid_spec=pltpu.PrefetchScalarGridSpec(
            num_scalar_prefetch=0,
            grid=(nb,),
            in_specs=[
                # current row block (pipelined, double-buffered by Pallas)
                pl.BlockSpec((tb, C_in), lambda i: (i, 0)),
                # halo = first g rows of the next block (clamped on last step;
                # kept outputs never depend on the clamped data)
                pl.BlockSpec(
                    (g, C_in),
                    lambda i: (jnp.minimum((i + 1) * hb, last_halo_blk), 0)),
                # weights / bias: constant index_maps -> resident in VMEM
                pl.BlockSpec((9, C_in, C_mid), lambda i: (0, 0, 0)),
                pl.BlockSpec((1, C_mid), lambda i: (0, 0)),
                pl.BlockSpec((C_mid, C_out_pad), lambda i: (0, 0)),
                pl.BlockSpec((1, C_out_pad), lambda i: (0, 0)),
            ],
            out_specs=pl.BlockSpec((tb, C_out_pad), lambda i: (i, 0)),
            scratch_shapes=[pltpu.VMEM((tb + g, C_in), jnp.float32)],
        ),
        compiler_params=pltpu.CompilerParams(
            dimension_semantics=("parallel",),     # megacore on v7x
            vmem_limit_bytes=32 * 1024 * 1024,     # safe on v5e/v6e/v7x
        ),
    )(xf, xf, w1, bn_shift, w2_p, b2_p)

    # Keep only rows whose 3x3 patch top-left lies in the interior; drop the
    # channel padding.  Row order is NHWC -> matches permute(0,2,3,1).view().
    out = out_p.reshape(N, Hp, Wp, C_out_pad)[:, :H, :W, :C_out]
    return out.astype(jnp.float32).reshape(N, H * W * num_anchors, 66)


def init_params(key, inchannels, num_anchors):
    C_mid = inchannels * 2
    C_out = num_anchors * 66
    ks = jax.random.split(key, 7)
    return {
        "w_conv3x3": 0.05 * jax.random.normal(ks[0], (C_mid, inchannels, 3, 3),
                                              jnp.float32),
        "bn_gamma": 1.0 + 0.1 * jax.random.normal(ks[1], (C_mid,), jnp.float32),
        "bn_beta": 0.1 * jax.random.normal(ks[2], (C_mid,), jnp.float32),
        "bn_mean": 0.1 * jax.random.normal(ks[3], (C_mid,), jnp.float32),
        "bn_var": 0.5 + jnp.abs(jax.random.normal(ks[4], (C_mid,), jnp.float32)),
        "w_conv1x1": 0.05 * jax.random.normal(ks[5], (C_out, C_mid, 1, 1),
                                              jnp.float32),
        "b_conv1x1": 0.05 * jax.random.normal(ks[6], (C_out,), jnp.float32),
    }


def reference_forward(x_nchw, params, num_anchors=3):
    """Pure-JAX reference (lax.conv, f32) for a sanity check."""
    h = jax.lax.conv_general_dilated(
        x_nchw, params["w_conv3x3"], window_strides=(1, 1), padding="SAME",
        dimension_numbers=("NCHW", "OIHW", "NCHW"))
    inv_std = 1.0 / jnp.sqrt(params["bn_var"] + 1e-5)
    h = (h - params["bn_mean"][None, :, None, None]) * \
        (params["bn_gamma"] * inv_std)[None, :, None, None] + \
        params["bn_beta"][None, :, None, None]
    h = jnp.maximum(h, 0.0)
    o = jax.lax.conv_general_dilated(
        h, params["w_conv1x1"], window_strides=(1, 1), padding="VALID",
        dimension_numbers=("NCHW", "OIHW", "NCHW"))
    o = o + params["b_conv1x1"][None, :, None, None]
    o = jnp.transpose(o, (0, 2, 3, 1))
    return o.reshape(o.shape[0], -1, 66)


if __name__ == "__main__":
    # Small shapes consistent with HeadPose: inchannels=16, num_anchors=3.
    N, C_IN, H, W = 2, 16, 8, 8
    NUM_ANCHORS = 3

    key = jax.random.PRNGKey(0)
    kx, kp = jax.random.split(key)
    x = jax.random.normal(kx, (N, C_IN, H, W), jnp.float32)
    params = init_params(kp, C_IN, NUM_ANCHORS)

    out = headpose_forward(x, params, num_anchors=NUM_ANCHORS)
    out = jax.block_until_ready(out)

    ref = reference_forward(x, params, num_anchors=NUM_ANCHORS)
    assert out.shape == (N, H * W * NUM_ANCHORS, 66), out.shape
    # bf16 inputs / bf16 second matmul / bf16 output with f32 accumulation.
    assert jnp.allclose(out, ref, atol=3e-2, rtol=3e-2), \
        float(jnp.max(jnp.abs(out - ref)))

    print("KERNEL_OK")
</pallas_src>

<mosaic_0001>
module attributes {stable_mosaic.version = 11 : i64} {
  func.func @kernel(%arg0: i32, %arg1: memref<128x16xbf16, #tpu.memory_space<vmem>>, %arg2: memref<32x16xbf16, #tpu.memory_space<vmem>>, %arg3: memref<9x16x32xf32, #tpu.memory_space<vmem>>, %arg4: memref<1x32xf32, #tpu.memory_space<vmem>>, %arg5: memref<32x256xbf16, #tpu.memory_space<vmem>>, %arg6: memref<1x256xf32, #tpu.memory_space<vmem>>, %arg7: memref<128x256xbf16, #tpu.memory_space<vmem>>, %arg8: memref<160x16xf32, #tpu.memory_space<vmem>>) attributes {dimension_semantics = [#tpu.dimension_semantics<parallel>], iteration_bounds = array<i64: 2>, scalar_prefetch = 0 : i64, scratch_operands = 1 : i64, tpu.core_type = #tpu.core_type<tc>, window_params = [{transform_indices = @transform_0, window_bounds = array<i64: 128, 16>}, {transform_indices = @transform_1, window_bounds = array<i64: 32, 16>}, {pipeline_mode = #tpu.pipeline_mode<synchronous>, transform_indices = @transform_2, window_bounds = array<i64: 9, 16, 32>}, {pipeline_mode = #tpu.pipeline_mode<synchronous>, transform_indices = @transform_3, window_bounds = array<i64: 1, 32>}, {pipeline_mode = #tpu.pipeline_mode<synchronous>, transform_indices = @transform_4, window_bounds = array<i64: 32, 256>}, {pipeline_mode = #tpu.pipeline_mode<synchronous>, transform_indices = @transform_5, window_bounds = array<i64: 1, 256>}, {transform_indices = @transform_6, window_bounds = array<i64: 128, 256>}]} {
    %c0 = arith.constant 0 : index
    %c0_0 = arith.constant 0 : index
    %0 = vector.load %arg1[%c0, %c0_0] : memref<128x16xbf16, #tpu.memory_space<vmem>>, vector<128x16xbf16>
    %1 = arith.extf %0 : vector<128x16xbf16> to vector<128x16xf32>
    %c0_1 = arith.constant 0 : index
    %c0_2 = arith.constant 0 : index
    %2 = vector.load %arg8[%c0_1, %c0_2] : memref<160x16xf32, #tpu.memory_space<vmem>>, vector<128x16xf32>
    tpu.vector_store %arg8[%c0_1, %c0_2], %1 {strides = array<i32>} : memref<160x16xf32, #tpu.memory_space<vmem>>, vector<128x16xf32>,
    %c0_3 = arith.constant 0 : index
    %c0_4 = arith.constant 0 : index
    %3 = vector.load %arg2[%c0_3, %c0_4] : memref<32x16xbf16, #tpu.memory_space<vmem>>, vector<32x16xbf16>
    %4 = arith.extf %3 : vector<32x16xbf16> to vector<32x16xf32>
    %c128 = arith.constant 128 : index
    %c0_5 = arith.constant 0 : index
    %5 = vector.load %arg8[%c128, %c0_5] : memref<160x16xf32, #tpu.memory_space<vmem>>, vector<32x16xf32>
    tpu.vector_store %arg8[%c128, %c0_5], %4 {strides = array<i32>} : memref<160x16xf32, #tpu.memory_space<vmem>>, vector<32x16xf32>,
    %c0_6 = arith.constant 0 : index
    %c0_7 = arith.constant 0 : index
    %6 = vector.load %arg8[%c0_6, %c0_7] : memref<160x16xf32, #tpu.memory_space<vmem>>, vector<128x16xf32>
    %c0_8 = arith.constant 0 : index
    %c0_9 = arith.constant 0 : index
    %c0_10 = arith.constant 0 : index
    %7 = vector.load %arg3[%c0_8, %c0_9, %c0_10] : memref<9x16x32xf32, #tpu.memory_space<vmem>>, vector<1x16x32xf32>
    %8 = vector.shape_cast %7 : vector<1x16x32xf32> to vector<16x32xf32>
    %cst = arith.constant dense<0.000000e+00> : vector<128x32xf32>
    %9 = tpu.matmul %6, %8, %cst {dimension_numbers = #tpu.dot_dimension_numbers<[1], [0], [0], [1], [0, 0, 1, 1], [], []>} : vector<128x16xf32>, vector<16x32xf32>, vector<128x32xf32> -> vector<128x32xf32>
    %c1 = arith.constant 1 : index
    %c0_11 = arith.constant 0 : index
    %10 = vector.load %arg8[%c1, %c0_11] : memref<160x16xf32, #tpu.memory_space<vmem>>, vector<128x16xf32>
    %c1_12 = arith.constant 1 : index
    %c0_13 = arith.constant 0 : index
    %c0_14 = arith.constant 0 : index
    %11 = vector.load %arg3[%c1_12, %c0_13, %c0_14] : memref<9x16x32xf32, #tpu.memory_space<vmem>>, vector<1x16x32xf32>
    %12 = vector.shape_cast %11 : vector<1x16x32xf32> to vector<16x32xf32>
    %cst_15 = arith.constant dense<0.000000e+00> : vector<128x32xf32>
    %13 = tpu.matmul %10, %12, %cst_15 {dimension_numbers = #tpu.dot_dimension_numbers<[1], [0], [0], [1], [0, 0, 1, 1], [], []>} : vector<128x16xf32>, vector<16x32xf32>, vector<128x32xf32> -> vector<128x32xf32>
    %14 = arith.addf %9, %13 : vector<128x32xf32>
    %c2 = arith.constant 2 : index
    %c0_16 = arith.constant 0 : index
    %15 = vector.load %arg8[%c2, %c0_16] : memref<160x16xf32, #tpu.memory_space<vmem>>, vector<128x16xf32>
    %c2_17 = arith.constant 2 : index
    %c0_18 = arith.constant 0 : index
    %c0_19 = arith.constant 0 : index
    %16 = vector.load %arg3[%c2_17, %c0_18, %c0_19] : memref<9x16x32xf32, #tpu.memory_space<vmem>>, vector<1x16x32xf32>
    %17 = vector.shape_cast %16 : vector<1x16x32xf32> to vector<16x32xf32>
    %cst_20 = arith.constant dense<0.000000e+00> : vector<128x32xf32>
    %18 = tpu.matmul %15, %17, %cst_20 {dimension_numbers = #tpu.dot_dimension_numbers<[1], [0], [0], [1], [0, 0, 1, 1], [], []>} : vector<128x16xf32>, vector<16x32xf32>, vector<128x32xf32> -> vector<128x32xf32>
    %19 = arith.addf %14, %18 : vector<128x32xf32>
    %c10 = arith.constant 10 : index
    %c0_21 = arith.constant 0 : index
    %20 = vector.load %arg8[%c10, %c0_21] : memref<160x16xf32, #tpu.memory_space<vmem>>, vector<128x16xf32>
    %c3 = arith.constant 3 : index
    %c0_22 = arith.constant 0 : index
    %c0_23 = arith.constant 0 : index
    %21 = vector.load %arg3[%c3, %c0_22, %c0_23] : memref<9x16x32xf32, #tpu.memory_space<vmem>>, vector<1x16x32xf32>
    %22 = vector.shape_cast %21 : vector<1x16x32xf32> to vector<16x32xf32>
    %cst_24 = arith.constant dense<0.000000e+00> : vector<128x32xf32>
    %23 = tpu.matmul %20, %22, %cst_24 {dimension_numbers = #tpu.dot_dimension_numbers<[1], [0], [0], [1], [0, 0, 1, 1], [], []>} : vector<128x16xf32>, vector<16x32xf32>, vector<128x32xf32> -> vector<128x32xf32>
    %24 = arith.addf %19, %23 : vector<128x32xf32>
    %c11 = arith.constant 11 : index
    %c0_25 = arith.constant 0 : index
    %25 = vector.load %arg8[%c11, %c0_25] : memref<160x16xf32, #tpu.memory_space<vmem>>, vector<128x16xf32>
    %c4 = arith.constant 4 : index
    %c0_26 = arith.constant 0 : index
    %c0_27 = arith.constant 0 : index
    %26 = vector.load %arg3[%c4, %c0_26, %c0_27] : memref<9x16x32xf32, #tpu.memory_space<vmem>>, vector<1x16x32xf32>
    %27 = vector.shape_cast %26 : vector<1x16x32xf32> to vector<16x32xf32>
    %cst_28 = arith.constant dense<0.000000e+00> : vector<128x32xf32>
    %28 = tpu.matmul %25, %27, %cst_28 {dimension_numbers = #tpu.dot_dimension_numbers<[1], [0], [0], [1], [0, 0, 1, 1], [], []>} : vector<128x16xf32>, vector<16x32xf32>, vector<128x32xf32> -> vector<128x32xf32>
    %29 = arith.addf %24, %28 : vector<128x32xf32>
    %c12 = arith.constant 12 : index
    %c0_29 = arith.constant 0 : index
    %30 = vector.load %arg8[%c12, %c0_29] : memref<160x16xf32, #tpu.memory_space<vmem>>, vector<128x16xf32>
    %c5 = arith.constant 5 : index
    %c0_30 = arith.constant 0 : index
    %c0_31 = arith.constant 0 : index
    %31 = vector.load %arg3[%c5, %c0_30, %c0_31] : memref<9x16x32xf32, #tpu.memory_space<vmem>>, vector<1x16x32xf32>
    %32 = vector.shape_cast %31 : vector<1x16x32xf32> to vector<16x32xf32>
    %cst_32 = arith.constant dense<0.000000e+00> : vector<128x32xf32>
    %33 = tpu.matmul %30, %32, %cst_32 {dimension_numbers = #tpu.dot_dimension_numbers<[1], [0], [0], [1], [0, 0, 1, 1], [], []>} : vector<128x16xf32>, vector<16x32xf32>, vector<128x32xf32> -> vector<128x32xf32>
    %34 = arith.addf %29, %33 : vector<128x32xf32>
    %c20 = arith.constant 20 : index
    %c0_33 = arith.constant 0 : index
    %35 = vector.load %arg8[%c20, %c0_33] : memref<160x16xf32, #tpu.memory_space<vmem>>, vector<128x16xf32>
    %c6 = arith.constant 6 : index
    %c0_34 = arith.constant 0 : index
    %c0_35 = arith.constant 0 : index
    %36 = vector.load %arg3[%c6, %c0_34, %c0_35] : memref<9x16x32xf32, #tpu.memory_space<vmem>>, vector<1x16x32xf32>
    %37 = vector.shape_cast %36 : vector<1x16x32xf32> to vector<16x32xf32>
    %cst_36 = arith.constant dense<0.000000e+00> : vector<128x32xf32>
    %38 = tpu.matmul %35, %37, %cst_36 {dimension_numbers = #tpu.dot_dimension_numbers<[1], [0], [0], [1], [0, 0, 1, 1], [], []>} : vector<128x16xf32>, vector<16x32xf32>, vector<128x32xf32> -> vector<128x32xf32>
    %39 = arith.addf %34, %38 : vector<128x32xf32>
    %c21 = arith.constant 21 : index
    %c0_37 = arith.constant 0 : index
    %40 = vector.load %arg8[%c21, %c0_37] : memref<160x16xf32, #tpu.memory_space<vmem>>, vector<128x16xf32>
    %c7 = arith.constant 7 : index
    %c0_38 = arith.constant 0 : index
    %c0_39 = arith.constant 0 : index
    %41 = vector.load %arg3[%c7, %c0_38, %c0_39] : memref<9x16x32xf32, #tpu.memory_space<vmem>>, vector<1x16x32xf32>
    %42 = vector.shape_cast %41 : vector<1x16x32xf32> to vector<16x32xf32>
    %cst_40 = arith.constant dense<0.000000e+00> : vector<128x32xf32>
    %43 = tpu.matmul %40, %42, %cst_40 {dimension_numbers = #tpu.dot_dimension_numbers<[1], [0], [0], [1], [0, 0, 1, 1], [], []>} : vector<128x16xf32>, vector<16x32xf32>, vector<128x32xf32> -> vector<128x32xf32>
    %44 = arith.addf %39, %43 : vector<128x32xf32>
    %c22 = arith.constant 22 : index
    %c0_41 = arith.constant 0 : index
    %45 = vector.load %arg8[%c22, %c0_41] : memref<160x16xf32, #tpu.memory_space<vmem>>, vector<128x16xf32>
    %c8 = arith.constant 8 : index
    %c0_42 = arith.constant 0 : index
    %c0_43 = arith.constant 0 : index
    %46 = vector.load %arg3[%c8, %c0_42, %c0_43] : memref<9x16x32xf32, #tpu.memory_space<vmem>>, vector<1x16x32xf32>
    %47 = vector.shape_cast %46 : vector<1x16x32xf32> to vector<16x32xf32>
    %cst_44 = arith.constant dense<0.000000e+00> : vector<128x32xf32>
    %48 = tpu.matmul %45, %47, %cst_44 {dimension_numbers = #tpu.dot_dimension_numbers<[1], [0], [0], [1], [0, 0, 1, 1], [], []>} : vector<128x16xf32>, vector<16x32xf32>, vector<128x32xf32> -> vector<128x32xf32>
    %49 = arith.addf %44, %48 : vector<128x32xf32>
    %c0_45 = arith.constant 0 : index
    %c0_46 = arith.constant 0 : index
    %50 = vector.load %arg4[%c0_45, %c0_46] : memref<1x32xf32, #tpu.memory_space<vmem>>, vector<1x32xf32>
    %51 = vector.broadcast %50 : vector<1x32xf32> to vector<128x32xf32>
    %52 = arith.addf %49, %51 : vector<128x32xf32>
    %cst_47 = arith.constant 0.000000e+00 : f32
    %53 = vector.broadcast %cst_47 : f32 to vector<128x32xf32>
    %54 = arith.maximumf %52, %53 : vector<128x32xf32>
    %55 = arith.truncf %54 : vector<128x32xf32> to vector<128x32xbf16>
    %c0_48 = arith.constant 0 : index
    %c0_49 = arith.constant 0 : index
    %56 = vector.load %arg5[%c0_48, %c0_49] : memref<32x256xbf16, #tpu.memory_space<vmem>>, vector<32x256xbf16>
    %cst_50 = arith.constant dense<0.000000e+00> : vector<128x256xf32>
    %57 = tpu.matmul %55, %56, %cst_50 {dimension_numbers = #tpu.dot_dimension_numbers<[1], [0], [0], [1], [0, 0, 1, 1], [], []>} : vector<128x32xbf16>, vector<32x256xbf16>, vector<128x256xf32> -> vector<128x256xf32>
    %c0_51 = arith.constant 0 : index
    %c0_52 = arith.constant 0 : index
    %58 = vector.load %arg6[%c0_51, %c0_52] : memref<1x256xf32, #tpu.memory_space<vmem>>, vector<1x256xf32>
    %59 = vector.broadcast %58 : vector<1x256xf32> to vector<128x256xf32>
    %60 = arith.addf %57, %59 : vector<128x256xf32>
    %61 = arith.truncf %60 : vector<128x256xf32> to vector<128x256xbf16>
    %c0_53 = arith.constant 0 : index
    %c0_54 = arith.constant 0 : index
    %62 = vector.load %arg7[%c0_53, %c0_54] : memref<128x256xbf16, #tpu.memory_space<vmem>>, vector<128x256xbf16>
    tpu.vector_store %arg7[%c0_53, %c0_54], %61 {strides = array<i32>} : memref<128x256xbf16, #tpu.memory_space<vmem>>, vector<128x256xbf16>,
    return
  }
  func.func @transform_0(%arg0: i32) -> (i32, i32) {
    %c0_i32 = arith.constant 0 : i32
    %c0_i32_0 = arith.constant 0 : i32
    return %arg0, %c0_i32 : i32, i32
  }
  func.func @transform_1(%arg0: i32) -> (i32, i32) {
    %c1_i32 = arith.constant 1 : i32
    %0 = arith.addi %arg0, %c1_i32 : i32
    %c4_i32 = arith.constant 4 : i32
    %1 = arith.muli %0, %c4_i32 : i32
    %c6_i32 = arith.constant 6 : i32
    %2 = arith.minsi %1, %c6_i32 : i32
    %c0_i32 = arith.constant 0 : i32
    %c0_i32_0 = arith.constant 0 : i32
    return %2, %c0_i32 : i32, i32
  }
  func.func @transform_2(%arg0: i32) -> (i32, i32, i32) {
    %c0_i32 = arith.constant 0 : i32
    %c0_i32_0 = arith.constant 0 : i32
    %c0_i32_1 = arith.constant 0 : i32
    %c0_i32_2 = arith.constant 0 : i32
    return %c0_i32, %c0_i32_0, %c0_i32_1 : i32, i32, i32
  }
  func.func @transform_3(%arg0: i32) -> (i32, i32) {
    %c0_i32 = arith.constant 0 : i32
    %c0_i32_0 = arith.constant 0 : i32
    %c0_i32_1 = arith.constant 0 : i32
    return %c0_i32, %c0_i32_0 : i32, i32
  }
  func.func @transform_4(%arg0: i32) -> (i32, i32) {
    %c0_i32 = arith.constant 0 : i32
    %c0_i32_0 = arith.constant 0 : i32
    %c0_i32_1 = arith.constant 0 : i32
    return %c0_i32, %c0_i32_0 : i32, i32
  }
  func.func @transform_5(%arg0: i32) -> (i32, i32) {
    %c0_i32 = arith.constant 0 : i32
    %c0_i32_0 = arith.constant 0 : i32
    %c0_i32_1 = arith.constant 0 : i32
    return %c0_i32, %c0_i32_0 : i32, i32
  }
  func.func @transform_6(%arg0: i32) -> (i32, i32) {
    %c0_i32 = arith.constant 0 : i32
    %c0_i32_0 = arith.constant 0 : i32
    return %arg0, %c0_i32 : i32, i32
  }
}

</mosaic_0001>

<bundles_post_ra>
// kernel: headpose_forward.1
= control target key start
LH: loop header
LB: loop body
LE: loop exit
PB: predicated region body
PF: predicated region fallthrough
CT: control target
= control target key end

     0   :  { %s3980_s21 = smov 0   ;;  %s3982_s22 = smov 0   ;;  %s4750_s0 = inlined_call_operand.vmem [shape: bf16[200,16], index: 0, kind: input, shape index: {}, may-alias: {0,1}]   ;;  %s4751_s1 = inlined_call_operand.vmem [shape: bf16[200,16], index: 1, kind: input, shape index: {}, may-alias: {0,1}]   ;;  %s4752_s2 = inlined_call_operand.vmem [shape: f32[9,16,32], index: 2, kind: input, shape index: {}]   ;;  %s4753_s3 = inlined_call_operand.vmem [shape: f32[1,32], index: 3, kind: input, shape index: {}]   ;;  %s4754_s4 = inlined_call_operand.vmem [shape: bf16[32,256], index: 4, kind: input, shape index: {}]   ;;  %s4755_s5 = inlined_call_operand.vmem [shape: f32[1,256], index: 5, kind: input, shape index: {}]   ;;  %s4756_s6 = inlined_call_operand.vmem [shape: bf16[200,256], index: 6, kind: output, shape index: {}]  }
   0x1   :  { %s3984_s23 = smov 0  }
   0x2 LB: > { %s3993_s24 = sadd.s32 4294967295, %s3910_s23   ;;  %s3995_s25 = sadd.s32 1, %s3910_s23   ;;  %s3910_s23 = sphi %s3984_s23, %s4775_s23   ;;  %s3906_s22 = sphi %s3982_s22, %s4774_s22   ;;  %s3902_s21 = sphi %s3980_s21, %s4773_s21  }
   0x3   : > { %s164_s26 = ssub.s32 %s3910_s23, %s3995_s25  ;;  %s167_s27 = sadd.s32 1, %s3906_s22 }
   0x4   : > { %p165_p0 = scmp.eq.s32.totalorder %s164_s26, 0  ;;  %p177_p1 = scmp.ne.s32.totalorder %s3906_s22, %s3902_s21 }
   0x5   : > { %p178_p2 = scmp.eq.s32.totalorder %s3993_s24, 1  ;;  %p3053_p3 = scmp.ge.s32.totalorder %s3910_s23, 1 }
   0x6   : > { %s4003_s28 = scalar_select %p165_p0, %s3906_s22, %s167_s27  }
   0x7   : > { %p4005_p4 = por %p178_p2, %p177_p1  ;;  %p256_p5 = scmp.lt.s32.totalorder %s3910_s23, 3 }
   0x9   : > { %p257_p6 = pnand %p3053_p3, %p256_p5 }
   0xb   : > { %260 = sbr.rel (%p257_p6) target bundleno = 683 (0x2ab), region = 44 }
  0x10   : > { %v3061_v0 = vld [vmem:[%s4752_s2 + $0x18] sm:$0xff]  ;;  %v3060_v1 = vld [vmem:[%s4752_s2 + $0x10] sm:$0xff]  ;;  %s4016_s10 = sshll.u32 %s3993_s24, 4  ;;  %v4021_v2 = vld [vmem:[%s4752_s2 + $0x8] sm:$0xff]  ;;  %s3272_s13 = sshll.u32 %s3993_s24, 2  ;;  %vm377_vm0 = vcmask 130048  }
  0x11   : > { %3505 = vmatprep.subr.mxu0 %v3061_v0  ;;  %p307_p7 = scmp.lt.s32.totalorder %s4016_s10, 24  ;;  %3757 = vmatprep.subr.mxu1 %v4021_v2  ;;  %v4029_v3 = vld [vmem:[%s4752_s2] sm:$0xff]  ;;  %s3273_s16 = sadd.s32 4, %s3272_s13  ;;  %v4035_v4 = vld [vmem:[%s4752_s2 + $0x38] sm:$0xff]  ;;  %v4084_v40 = vld [vmem:[%s4752_s2 + $0x28] sm:$0xff]  ;;  %vm2508_vm1 = vcmask 261120  }
  0x12   : > { %3506 = vmatpush3.msra.mxu0 %v3061_v0  ;;  %3759 = vmatpush3.msra.mxu1 %v4021_v2  ;;  %p318_p8 = scmp.lt.s32.totalorder %s3273_s16, 6  ;;  %v3112_v42 = vld [vmem:[%s4752_s2 + $0x30] sm:$0xff]  ;;  %v3149_v46 = vld [vmem:[%s4752_s2 + $0x58] sm:$0xff]  ;;  %s299_s17 = sand.u32 1, %s3902_s21  }
  0x13   : > { %3507 = vmatprep.subr.mxu0 %v3060_v1  ;;  %s308_s19 = scalar_select %p307_p7, %s4016_s10, 24  ;;  %3758 = vmatprep.subr.mxu1 %v4029_v3  ;;  %v3148_v59 = vld [vmem:[%s4752_s2 + $0x50] sm:$0xff]  ;;  %v4136_v0 = vld [vmem:[%s4752_s2 + $0x78] sm:$0xff] }
  0x14   : > { %3508 = vmatpush3.msra.mxu0 %v3060_v1  ;;  %3760 = vmatpush3.msra.mxu1 %v4029_v3  ;;  %s4777_s16 = smov (!%p318_p8, %s3273_s16), 6  ;;  %s3054_s18 = sshll.u32 %s299_s17, 7 }
  0x15   : > { %s3056_s20 = sshll.u32 %s308_s19, 2  ;;  %3533 = vmatprep.subr.mxu0 %v4021_v2  ;;  %3589 = vmatprep.subr.mxu1 %v4035_v4  ;;  %s3058_s30 = sshll.u32 %s4777_s16, 2 }
  0x16   : > { %s310_s27 = scalar_lea.vmem %s4750_s0, %s3056_s20  ;;  %p4045_p9 = scmp.lt.s32.totalorder %s3058_s30, 24 }
  0x17   : > { %v3296_v5 = vld [vmem:[%s310_s27] sm:$0xff]   ;;  %v3335_v6 = vld [vmem:[%s310_s27 + $0x8] sm:$0xff]   ;;  %v3336_v7 = vld [vmem:[%s310_s27 + $0x10] sm:$0xff]   ;;  %s4602_s19 = scalar_lea.vmem [#allocation3], %s3054_s18   ;;  %s2766_s21 = ssub.s32 (%p4005_p4), 25, %s4016_s10 }
  0x18   : > { %v3297_v8 = vunpack.c.l.bf16 %v3296_v5  ;;  %v3298_v9 = vunpack.c.h.bf16 %v3296_v5  ;;  %v3301_v10 = vunpack.c.l.bf16 %v3335_v6  ;;  %v3302_v11 = vunpack.c.h.bf16 %v3335_v6  ;;  %v3337_v12 = vld [vmem:[%s310_s27 + $0x18] sm:$0xff]   ;;  %v3338_v13 = vld [vmem:[%s310_s27 + $0x20] sm:$0xff]   ;;  %v3339_v14 = vld [vmem:[%s310_s27 + $0x28] sm:$0xff]   ;;  %s4779_s30 = smov (!%p4045_p9, %s3058_s30), 24  ;;  %s3292_s20 = sshll.u32 (%p4005_p4), %s3993_s24, 7 }
  0x19   : > { %v3305_v15 = vunpack.c.l.bf16 %v3336_v7  ;;  %v3306_v16 = vunpack.c.h.bf16 %v3336_v7  ;;  %v3309_v17 = vunpack.c.l.bf16 %v3337_v12  ;;  %v3310_v18 = vunpack.c.h.bf16 %v3337_v12  ;;  %v3340_v19 = vld [vmem:[%s310_s27 + $0x30] sm:$0xff]   ;;  %v3341_v20 = vld [vmem:[%s310_s27 + $0x38] sm:$0xff]   ;;  %s3059_s8 = sshll.u32 %s4779_s30, 2  ;;  %p2767_p10 = scmp.lt.s32.totalorder (%p4005_p4), %s2766_s21, 16 }
  0x1a   : > { %378 = vst.msk [vmem:[#allocation2] sm:$0xff] %vm377_vm0, %v3297_v8  ;;  %379 = vst.msk [vmem:[#allocation2 + $0x8] sm:$0xff] %vm377_vm0, %v3298_v9  ;;  %v3313_v21 = vunpack.c.l.bf16 %v3338_v13  ;;  %v3314_v22 = vunpack.c.h.bf16 %v3338_v13  ;;  %v3317_v23 = vunpack.c.l.bf16 %v3339_v14  ;;  %v3318_v24 = vunpack.c.h.bf16 %v3339_v14  ;;  %s4066_s12 = scalar_lea.vmem %s4751_s1, %s3059_s8  ;;  %v3131_v14 = vld [vmem:[%s4752_s2 + $0x48] sm:$0xff]  ;;  %s4657_s27 = scalar_lea.vmem (%p4005_p4), %s4756_s6, %s3292_s20  }
  0x1b   : > { %380 = vst.msk [vmem:[#allocation2 + $0x10] sm:$0xff] %vm377_vm0, %v3301_v10  ;;  %381 = vst.msk [vmem:[#allocation2 + $0x18] sm:$0xff] %vm377_vm0, %v3302_v11  ;;  %v3321_v25 = vunpack.c.l.bf16 %v3340_v19  ;;  %v3322_v26 = vunpack.c.h.bf16 %v3340_v19  ;;  %v3325_v27 = vunpack.c.l.bf16 %v3341_v20  ;;  %v3326_v28 = vunpack.c.h.bf16 %v3341_v20  ;;  %v3328_v29 = vld [vmem:[%s4066_s12] sm:$0xff]   ;;  %v3342_v8 = vld [vmem:[%s4066_s12 + $0x8] sm:$0xff]  }
  0x1c   : > { %382 = vst.msk [vmem:[#allocation2 + $0x20] sm:$0xff] %vm377_vm0, %v3305_v15  ;;  %383 = vst.msk [vmem:[#allocation2 + $0x28] sm:$0xff] %vm377_vm0, %v3306_v16  ;;  %v3329_v30 = vunpack.c.l.bf16 %v3328_v29  ;;  %v3330_v31 = vunpack.c.h.bf16 %v3328_v29  ;;  %v3333_v10 = vunpack.c.l.bf16 %v3342_v8  ;;  %v3094_v11 = vld [vmem:[%s4752_s2 + $0x20] sm:$0xff]  ;;  %v3167_v29 = vld [vmem:[%s4752_s2 + $0x68] sm:$0xff] }
  0x1d   : > { %384 = vst.msk [vmem:[#allocation2 + $0x30] sm:$0xff] %vm377_vm0, %v3309_v17  ;;  %385 = vst.msk [vmem:[#allocation2 + $0x38] sm:$0xff] %vm377_vm0, %v3310_v18 }
  0x1e   : > { %386 = vst.msk [vmem:[#allocation2 + $0x40] sm:$0xff] %vm377_vm0, %v3313_v21  ;;  %387 = vst.msk [vmem:[#allocation2 + $0x48] sm:$0xff] %vm377_vm0, %v3314_v22 }
  0x1f   : > { %388 = vst.msk [vmem:[#allocation2 + $0x50] sm:$0xff] %vm377_vm0, %v3317_v23  ;;  %389 = vst.msk [vmem:[#allocation2 + $0x58] sm:$0xff] %vm377_vm0, %v3318_v24 }
  0x20   : > { %390 = vst.msk [vmem:[#allocation2 + $0x60] sm:$0xff] %vm377_vm0, %v3321_v25  ;;  %391 = vst.msk [vmem:[#allocation2 + $0x68] sm:$0xff] %vm377_vm0, %v3322_v26 }
  0x21   : > { %392 = vst.msk [vmem:[#allocation2 + $0x70] sm:$0xff] %vm377_vm0, %v3325_v27  ;;  %393 = vst.msk [vmem:[#allocation2 + $0x78] sm:$0xff] %vm377_vm0, %v3326_v28  ;;  %v424_v32 = vld [vmem:[#allocation2 + $0x1] sm:$0xff] }
  0x22   : > { %402 = vst.msk [vmem:[#allocation2 + $0x80] sm:$0xff] %vm377_vm0, %v3329_v30  ;;  %403 = vst.msk [vmem:[#allocation2 + $0x88] sm:$0xff] %vm377_vm0, %v3330_v31  ;;  %v425_v33 = vld [vmem:[#allocation2 + $0x9] sm:$0xff]  ;;  %v426_v34 = vld [vmem:[#allocation2 + $0x11] sm:$0xff]  ;;  %3509 = vmatprep.mubr.msk.f32.mxu0 %vm377_vm0, %v424_v32 }
  0x23   : > { %3510 = vmatmul.mubr.msk.f32.vlgmr.msra.gmra.mxu0 %vm377_vm0, %v425_v33  ;;  %v427_v35 = vld [vmem:[#allocation2 + $0x19] sm:$0xff]  ;;  %v428_v38 = vld [vmem:[#allocation2 + $0x21] sm:$0xff]  ;;  %v4107_v53 = vld [vmem:[#allocation2 + $0xa] sm:$0xff]  ;;  %404 = vst.msk [vmem:[#allocation2 + $0x90] sm:$0xff] %vm377_vm0, %v3333_v10 }
  0x24   : > { %3534 = vmatpush3.msra.mxu0 %v4021_v2  ;;  %3512 = vmatprep.mubr.msk.f32.mxu0 %vm377_vm0, %v426_v34  ;;  %v429_v43 = vld [vmem:[#allocation2 + $0x29] sm:$0xff]  ;;  %v430_v45 = vld [vmem:[#allocation2 + $0x31] sm:$0xff]  ;;  %v4116_v57 = vld [vmem:[#allocation2 + $0x1a] sm:$0xff] }
  0x25   : > { %v414_v36 = vld [vmem:[#allocation2 + $0x40] sm:$0xff]  ;;  %v415_v37 = vld [vmem:[#allocation2 + $0x48] sm:$0xff]  ;;  %3535 = vmatprep.subr.mxu0 %v4029_v3  ;;  %v4113_v55 = vld [vmem:[#allocation2 + $0x12] sm:$0xff] }
  0x26   : > { %3549 = vmatprep.mubr.msk.f32.mxu1 %vm377_vm0, %v414_v36  ;;  %v416_v39 = vld [vmem:[#allocation2 + $0x50] sm:$0xff]  ;;  %3536 = vmatpush3.msra.mxu0 %v4029_v3  ;;  %v417_v41 = vld [vmem:[#allocation2 + $0x58] sm:$0xff]  ;;  %v432_v50 = vld [vmem:[#allocation2 + $0x41] sm:$0xff] }
  0x27   : > { %3550 = vmatmul.mubr.msk.f32.vlgmr.msra.gmra.mxu1 %vm377_vm0, %v415_v37  ;;  %3513 = vmatmul.mubr.msk.f32.gmra.mxu0 %vm377_vm0, %v427_v35  ;;  %v418_v44 = vld [vmem:[#allocation2 + $0x60] sm:$0xff]  ;;  %v419_v47 = vld [vmem:[#allocation2 + $0x68] sm:$0xff]  ;;  %v434_v54 = vld [vmem:[#allocation2 + $0x51] sm:$0xff] }
  0x28   : > { %3552 = vmatprep.mubr.msk.f32.mxu1 %vm377_vm0, %v416_v39  ;;  %3515 = vmatprep.mubr.msk.f32.mxu0 %vm377_vm0, %v428_v38  ;;  %v431_v48 = vld [vmem:[#allocation2 + $0x39] sm:$0xff]  ;;  %v420_v49 = vld [vmem:[#allocation2 + $0x70] sm:$0xff]  ;;  %v436_v58 = vld [vmem:[#allocation2 + $0x61] sm:$0xff] }
  0x29   : > { %3561 = vmatprep.subr.mxu0 %v4084_v40  ;;  %3590 = vmatpush3.msra.mxu1 %v4035_v4  ;;  %v421_v51 = vld [vmem:[#allocation2 + $0x78] sm:$0xff]  ;;  %v433_v52 = vld [vmem:[#allocation2 + $0x49] sm:$0xff]  ;;  %v406_v4 = vld [vmem:[#allocation2] sm:$0xff] }
  0x2a   : > { %3591 = vmatprep.subr.mxu1 %v3112_v42  ;;  %v435_v56 = vld [vmem:[#allocation2 + $0x59] sm:$0xff]  ;;  %v4126_v60 = vld [vmem:[#allocation2 + $0x22] sm:$0xff]  ;;  %v4129_v62 = vld [vmem:[#allocation2 + $0x2a] sm:$0xff] }
  0x2b   : > { %3553 = vmatmul.mubr.msk.f32.gmra.mxu1 %vm377_vm0, %v417_v41  ;;  %3516 = vmatmul.mubr.msk.f32.gmra.mxu0 %vm377_vm0, %v429_v43  ;;  %v437_v61 = vld [vmem:[#allocation2 + $0x69] sm:$0xff]  ;;  %v438_v63 = vld [vmem:[#allocation2 + $0x71] sm:$0xff]  ;;  %v439_v2 = vld [vmem:[#allocation2 + $0x79] sm:$0xff] }
  0x2c   : > { %3555 = vmatprep.mubr.msk.f32.mxu1 %vm377_vm0, %v418_v44  ;;  %3518 = vmatprep.mubr.msk.f32.mxu0 %vm377_vm0, %v430_v45  ;;  %v4141_v1 = vld [vmem:[#allocation2 + $0x32] sm:$0xff]  ;;  %v4144_v3 = vld [vmem:[#allocation2 + $0x3a] sm:$0xff]  ;;  %v4152_v5 = vld [vmem:[#allocation2 + $0x42] sm:$0xff] }
  0x2d   : > { %3592 = vmatpush3.msra.mxu1 %v3112_v42  ;;  %v407_v6 = vld [vmem:[#allocation2 + $0x8] sm:$0xff]  ;;  %v408_v9 = vld [vmem:[#allocation2 + $0x10] sm:$0xff]  ;;  %v409_v13 = vld [vmem:[#allocation2 + $0x18] sm:$0xff] }
  0x2e   : > { %3645 = vmatprep.subr.mxu1 %v3149_v46  ;;  %v4155_v7 = vld [vmem:[#allocation2 + $0x4a] sm:$0xff]  ;;  %v4166_v12 = vld [vmem:[#allocation2 + $0x52] sm:$0xff]  ;;  %v410_v15 = vld [vmem:[#allocation2 + $0x20] sm:$0xff] }
  0x2f   : > { %3556 = vmatmul.mubr.msk.f32.gmra.mxu1 %vm377_vm0, %v419_v47  ;;  %3519 = vmatmul.mubr.msk.f32.gmra.mxu0 %vm377_vm0, %v431_v48  ;;  %v4174_v16 = vld [vmem:[#allocation2 + $0x5a] sm:$0xff]  ;;  %v4179_v17 = vld [vmem:[#allocation2 + $0x62] sm:$0xff]  ;;  %v4184_v19 = vld [vmem:[#allocation2 + $0x6a] sm:$0xff] }
  0x30   : > { %3558 = vmatprep.mubr.msk.f32.mxu1 %vm377_vm0, %v420_v49  ;;  %3521 = vmatprep.mubr.msk.f32.mxu0 %vm377_vm0, %v432_v50  ;;  %v411_v18 = vld [vmem:[#allocation2 + $0x28] sm:$0xff]  ;;  %v412_v20 = vld [vmem:[#allocation2 + $0x30] sm:$0xff]  ;;  %v413_v22 = vld [vmem:[#allocation2 + $0x38] sm:$0xff] }
  0x31   : > { %v1070_v21 = vld [vmem:[#allocation2 + $0x72] sm:$0xff]  ;;  %v844_v23 = vld [vmem:[#allocation2 + $0x7a] sm:$0xff]  ;;  %v829_v24 = vld [vmem:[#allocation2 + $0x2] sm:$0xff] }
  0x32   : > { %v1072_v25 = vld [vmem:[#allocation2 + $0x82] sm:$0xff]  ;;  %v1513_v26 = vld [vmem:[#allocation2 + $0xc] sm:$0xff]  ;;  %v4203_v28 = vld [vmem:[#allocation2 + $0x14] sm:$0xff] }
  0x33   : > { %3559 = vmatmul.mubr.msk.f32.gmra.mxu1 %vm377_vm0, %v421_v51  ;;  %3522 = vmatmul.mubr.msk.f32.gmra.mxu0 %vm377_vm0, %v433_v52  ;;  %v3130_v27 = vld [vmem:[%s4752_s2 + $0x40] sm:$0xff]  ;;  %v3184_v32 = vld [vmem:[%s4752_s2 + $0x70] sm:$0xff]  ;;  %v3203_v52 = vld [vmem:[%s4752_s2 + $0x88] sm:$0xff] }
  0x34   : > { %3593 = vmatprep.mubr.msk.f32.mxu1 %vm377_vm0, %v4107_v53  ;;  %3524 = vmatprep.mubr.msk.f32.mxu0 %vm377_vm0, %v434_v54  ;;  %v4210_v30 = vld [vmem:[#allocation2 + $0x1c] sm:$0xff]  ;;  %v4216_v31 = vld [vmem:[#allocation2 + $0x24] sm:$0xff]  ;;  %v4225_v33 = vld [vmem:[#allocation2 + $0x2c] sm:$0xff] }
  0x35   : > { %v4234_v34 = vld [vmem:[#allocation2 + $0x34] sm:$0xff]  ;;  %v4238_v35 = vld [vmem:[#allocation2 + $0x3c] sm:$0xff]  ;;  %v4246_v36 = vld [vmem:[#allocation2 + $0x44] sm:$0xff] }
  0x36   : > { %v4250_v37 = vld [vmem:[#allocation2 + $0x4c] sm:$0xff]  ;;  %v4258_v38 = vld [vmem:[#allocation2 + $0x54] sm:$0xff]  ;;  %v4262_v39 = vld [vmem:[#allocation2 + $0x5c] sm:$0xff] }
  0x37   : > { %3594 = vmatmul.mubr.msk.f32.vlgmr.msra.gmra.mxu1 %vm377_vm0, %v4113_v55  ;;  %3525 = vmatmul.mubr.msk.f32.gmra.mxu0 %vm377_vm0, %v435_v56  ;;  %v4274_v41 = vld [vmem:[#allocation2 + $0x6c] sm:$0xff]  ;;  %v4282_v42 = vld [vmem:[#allocation2 + $0x74] sm:$0xff]  ;;  %v4285_v43 = vld [vmem:[#allocation2 + $0x7c] sm:$0xff] }
  0x38   : > { %3596 = vmatprep.mubr.msk.f32.mxu1 %vm377_vm0, %v4116_v57  ;;  %3527 = vmatprep.mubr.msk.f32.mxu0 %vm377_vm0, %v436_v58  ;;  %v1285_v44 = vld [vmem:[#allocation2 + $0xb] sm:$0xff]  ;;  %v1969_v47 = vld [vmem:[#allocation2 + $0x15] sm:$0xff]  ;;  %v3166_v49 = vld [vmem:[%s4752_s2 + $0x60] sm:$0xff] }
  0x39   : > { %3646 = vmatpush3.msra.mxu1 %v3149_v46  ;;  %v4292_v45 = vld [vmem:[#allocation2 + $0x84] sm:$0xff]  ;;  %v1286_v46 = vld [vmem:[#allocation2 + $0x13] sm:$0xff]  ;;  %v1287_v48 = vld [vmem:[#allocation2 + $0x1b] sm:$0xff] }
  0x3a   : > { %3647 = vmatprep.subr.mxu1 %v3148_v59  ;;  %v1970_v50 = vld [vmem:[#allocation2 + $0x1d] sm:$0xff]  ;;  %v1971_v54 = vld [vmem:[#allocation2 + $0x25] sm:$0xff]  ;;  %v1290_v56 = vld [vmem:[#allocation2 + $0x33] sm:$0xff] }
  0x3b   : > { %3597 = vmatmul.mubr.msk.f32.gmra.mxu1 %vm377_vm0, %v4126_v60  ;;  %3528 = vmatmul.mubr.msk.f32.gmra.mxu0 %vm377_vm0, %v437_v61  ;;  %v1288_v51 = vld [vmem:[#allocation2 + $0x23] sm:$0xff]  ;;  %v1291_v58 = vld [vmem:[#allocation2 + $0x3b] sm:$0xff]  ;;  %v1298_v8 = vld [vmem:[#allocation2 + $0x73] sm:$0xff] }
  0x3c   : > { %3599 = vmatprep.mubr.msk.f32.mxu1 %vm377_vm0, %v4129_v62  ;;  %3530 = vmatprep.mubr.msk.f32.mxu0 %vm377_vm0, %v438_v63  ;;  %v1975_v61 = vld [vmem:[#allocation2 + $0x45] sm:$0xff]  ;;  %v1976_v63 = vld [vmem:[#allocation2 + $0x4d] sm:$0xff]  ;;  %v1299_v10 = vld [vmem:[#allocation2 + $0x7b] sm:$0xff] }
  0x3d   : > { %3648 = vmatpush3.msra.mxu1 %v3148_v59  ;;  %v1974_v59 = vld [vmem:[#allocation2 + $0x3d] sm:$0xff] }
  0x3e   : > { %3701 = vmatprep.subr.mxu1 %v4136_v0 }
  0x3f   : > { %3600 = vmatmul.mubr.msk.f32.gmra.mxu1 %vm377_vm0, %v4141_v1  ;;  %3531 = vmatmul.mubr.msk.f32.gmra.mxu0 %vm377_vm0, %v439_v2  ;;  %v1295_v2 = vld [vmem:[#allocation2 + $0x5b] sm:$0xff] }
  0x40   : > { %3602 = vmatprep.mubr.msk.f32.mxu1 %vm377_vm0, %v4144_v3  ;;  %3537 = vmatprep.mubr.msk.f32.mxu0 %vm377_vm0, %v406_v4  ;;  %v1296_v4 = vld [vmem:[#allocation2 + $0x63] sm:$0xff] }
  0x43   : > { %3603 = vmatmul.mubr.msk.f32.gmra.mxu1 %vm377_vm0, %v4152_v5  ;;  %3538 = vmatmul.mubr.msk.f32.vlgmr.msra.gmra.mxu0 %vm377_vm0, %v407_v6  ;;  %v1297_v6 = vld [vmem:[#allocation2 + $0x6b] sm:$0xff] }
  0x44   : > { %3605 = vmatprep.mubr.msk.f32.mxu1 %vm377_vm0, %v4155_v7  ;;  %3562 = vmatpush3.msra.mxu0 %v4084_v40  ;;  %v4270_v40 = vld [vmem:[#allocation2 + $0x64] sm:$0xff] }
  0x45   : > { %3540 = vmatprep.mubr.msk.f32.mxu0 %vm377_vm0, %v408_v9  ;;  %3563 = vmatprep.subr.mxu0 %v3094_v11  ;;  %v1981_v9 = vld [vmem:[#allocation2 + $0x75] sm:$0xff] }
  0x46   : > { %3564 = vmatpush3.msra.mxu0 %v3094_v11  ;;  %v1982_v11 = vld [vmem:[#allocation2 + $0x7d] sm:$0xff] }
  0x47   : > { %3606 = vmatmul.mubr.msk.f32.gmra.mxu1 %vm377_vm0, %v4166_v12  ;;  %3541 = vmatmul.mubr.msk.f32.gmra.mxu0 %vm377_vm0, %v409_v13  ;;  %v1983_v13 = vld [vmem:[#allocation2 + $0x85] sm:$0xff] }
  0x48   : > { %3617 = vmatprep.subr.mxu0 %v3131_v14  ;;  %3543 = vmatprep.mubr.msk.f32.mxu0 %vm377_vm0, %v410_v15  ;;  %v3202_v15 = vld [vmem:[%s4752_s2 + $0x80] sm:$0xff] }
  0x49   : > { %3608 = vmatprep.mubr.msk.f32.mxu1 %vm377_vm0, %v4174_v16 }
  0x4b   : > { %3609 = vmatmul.mubr.msk.f32.gmra.mxu1 %vm377_vm0, %v4179_v17  ;;  %3544 = vmatmul.mubr.msk.f32.gmra.mxu0 %vm377_vm0, %v411_v18  ;;  %v2198_v18 = vld [vmem:[#allocation2 + $0x1e] sm:$0xff] }
  0x4c   : > { %3611 = vmatprep.mubr.msk.f32.mxu1 %vm377_vm0, %v4184_v19  ;;  %3546 = vmatprep.mubr.msk.f32.mxu0 %vm377_vm0, %v412_v20  ;;  %v2200_v20 = vld [vmem:[#allocation2 + $0x2e] sm:$0xff] }
  0x4f   : > { %3612 = vmatmul.mubr.msk.f32.gmra.mxu1 %vm377_vm0, %v1070_v21  ;;  %3547 = vmatmul.mubr.msk.f32.gmra.mxu0 %vm377_vm0, %v413_v22  ;;  %v2202_v22 = vld [vmem:[#allocation2 + $0x3e] sm:$0xff] }
  0x50   : > { %3614 = vmatprep.mubr.msk.f32.mxu1 %vm377_vm0, %v844_v23  ;;  %3565 = vmatprep.mubr.msk.f32.mxu0 %vm377_vm0, %v829_v24  ;;  %v2204_v24 = vld [vmem:[#allocation2 + $0x4e] sm:$0xff] }
  0x53   : > { %3615 = vmatmul.mubr.msk.f32.gmra.mxu1 %vm377_vm0, %v1072_v25  ;;  %3566 = vmatmul.mubr.msk.f32.vlgmr.msra.gmra.mxu0 %vm377_vm0, %v4107_v53  ;;  %v1289_v53 = vld [vmem:[#allocation2 + $0x2b] sm:$0xff]  ;;  %v2205_v25 = vld [vmem:[#allocation2 + $0x56] sm:$0xff] }
  0x54   : > { %3649 = vmatprep.mubr.msk.f32.mxu1 %vm377_vm0, %v1513_v26  ;;  %3618 = vmatpush3.msra.mxu0 %v3131_v14  ;;  %v1984_v14 = vld [vmem:[#allocation2 + $0x8d] sm:$0xff]  ;;  %v2206_v26 = vld [vmem:[#allocation2 + $0x5e] sm:$0xff] }
  0x55   : > { %3568 = vmatprep.mubr.msk.f32.mxu0 %vm377_vm0, %v4113_v55  ;;  %3619 = vmatprep.subr.mxu0 %v3130_v27  ;;  %v1972_v55 = vld [vmem:[#allocation2 + $0x2d] sm:$0xff] }
  0x56   : > { %3620 = vmatpush3.msra.mxu0 %v3130_v27  ;;  %v2207_v27 = vld [vmem:[#allocation2 + $0x66] sm:$0xff] }
  0x57   : > { %3650 = vmatmul.mubr.msk.f32.vlgmr.msra.gmra.mxu1 %vm377_vm0, %v4203_v28  ;;  %3569 = vmatmul.mubr.msk.f32.gmra.mxu0 %vm377_vm0, %v4116_v57  ;;  %v1973_v57 = vld [vmem:[#allocation2 + $0x35] sm:$0xff] }
  0x58   : > { %3673 = vmatprep.subr.mxu0 %v3167_v29  ;;  %3571 = vmatprep.mubr.msk.f32.mxu0 %vm377_vm0, %v4126_v60  ;;  %v1292_v60 = vld [vmem:[#allocation2 + $0x43] sm:$0xff] }
  0x59   : > { %3652 = vmatprep.mubr.msk.f32.mxu1 %vm377_vm0, %v4210_v30  ;;  %3702 = vmatpush3.msra.mxu1 %v4136_v0  ;;  %v1294_v0 = vld [vmem:[#allocation2 + $0x53] sm:$0xff] }
  0x5a   : > { %3703 = vmatprep.subr.mxu1 %v3184_v32 }
  0x5b   : > { %3653 = vmatmul.mubr.msk.f32.gmra.mxu1 %vm377_vm0, %v4216_v31  ;;  %3572 = vmatmul.mubr.msk.f32.gmra.mxu0 %vm377_vm0, %v4129_v62  ;;  %v1293_v62 = vld [vmem:[#allocation2 + $0x4b] sm:$0xff] }
  0x5c   : > { %3655 = vmatprep.mubr.msk.f32.mxu1 %vm377_vm0, %v4225_v33  ;;  %3574 = vmatprep.mubr.msk.f32.mxu0 %vm377_vm0, %v4141_v1  ;;  %v1977_v1 = vld [vmem:[#allocation2 + $0x55] sm:$0xff] }
  0x5d   : > { %3704 = vmatpush3.msra.mxu1 %v3184_v32  ;;  %v2212_v32 = vld [vmem:[#allocation2 + $0x8e] sm:$0xff] }
  0x5f   : > { %3656 = vmatmul.mubr.msk.f32.gmra.mxu1 %vm377_vm0, %v4234_v34  ;;  %3575 = vmatmul.mubr.msk.f32.gmra.mxu0 %vm377_vm0, %v4144_v3  ;;  %v1978_v3 = vld [vmem:[#allocation2 + $0x5d] sm:$0xff] }
  0x60   : > { %3658 = vmatprep.mubr.msk.f32.mxu1 %vm377_vm0, %v4238_v35  ;;  %3577 = vmatprep.mubr.msk.f32.mxu0 %vm377_vm0, %v4152_v5  ;;  %v1979_v5 = vld [vmem:[#allocation2 + $0x65] sm:$0xff] }
  0x63   : > { %3659 = vmatmul.mubr.msk.f32.gmra.mxu1 %vm377_vm0, %v4246_v36  ;;  %3578 = vmatmul.mubr.msk.f32.gmra.mxu0 %vm377_vm0, %v4155_v7  ;;  %v1980_v7 = vld [vmem:[#allocation2 + $0x6d] sm:$0xff] }
  0x64   : > { %3661 = vmatprep.mubr.msk.f32.mxu1 %vm377_vm0, %v4250_v37  ;;  %3580 = vmatprep.mubr.msk.f32.mxu0 %vm377_vm0, %v4166_v12  ;;  %v1300_v12 = vld [vmem:[#allocation2 + $0x83] sm:$0xff] }
  0x67   : > { %3662 = vmatmul.mubr.msk.f32.gmra.mxu1 %vm377_vm0, %v4258_v38  ;;  %3581 = vmatmul.mubr.msk.f32.gmra.mxu0 %vm377_vm0, %v4174_v16  ;;  %v1756_v16 = vld [vmem:[#allocation2 + $0x8c] sm:$0xff] }
  0x68   : > { %3664 = vmatprep.mubr.msk.f32.mxu1 %vm377_vm0, %v4262_v39  ;;  %3583 = vmatprep.mubr.msk.f32.mxu0 %vm377_vm0, %v4179_v17  ;;  %v2197_v17 = vld [vmem:[#allocation2 + $0x16] sm:$0xff] }
  0x6b   : > { %3665 = vmatmul.mubr.msk.f32.gmra.mxu1 %vm377_vm0, %v4270_v40  ;;  %3584 = vmatmul.mubr.msk.f32.gmra.mxu0 %vm377_vm0, %v4184_v19  ;;  %v2199_v19 = vld [vmem:[#allocation2 + $0x26] sm:$0xff] }
  0x6c   : > { %3667 = vmatprep.mubr.msk.f32.mxu1 %vm377_vm0, %v4274_v41  ;;  %3586 = vmatprep.mubr.msk.f32.mxu0 %vm377_vm0, %v1070_v21  ;;  %v2201_v21 = vld [vmem:[#allocation2 + $0x36] sm:$0xff] }
  0x6f   : > { %3668 = vmatmul.mubr.msk.f32.gmra.mxu1 %vm377_vm0, %v4282_v42  ;;  %3587 = vmatmul.mubr.msk.f32.gmra.mxu0 %vm377_vm0, %v844_v23  ;;  %v2203_v23 = vld [vmem:[#allocation2 + $0x46] sm:$0xff] }
  0x70   : > { %3670 = vmatprep.mubr.msk.f32.mxu1 %vm377_vm0, %v4285_v43  ;;  %3621 = vmatprep.mubr.msk.f32.mxu0 %vm377_vm0, %v1285_v44 }
  0x73   : > { %3671 = vmatmul.mubr.msk.f32.gmra.mxu1 %vm377_vm0, %v4292_v45  ;;  %3622 = vmatmul.mubr.msk.f32.vlgmr.msra.gmra.mxu0 %vm377_vm0, %v1286_v46  ;;  %v3853_v46 = vld [vmem:[%s4754_s4] ss:$8 sps:$4 sm:$0xff]  }
  0x74   : > { %3705 = vmatprep.mubr.msk.f32.mxu1 %vm377_vm0, %v1969_v47  ;;  %3674 = vmatpush3.msra.mxu0 %v3167_v29  ;;  %v2209_v29 = vld [vmem:[#allocation2 + $0x76] sm:$0xff]  ;;  %v3855_v47 = vld [vmem:[%s4754_s4 + $0x4] ss:$8 sps:$4 sm:$0xff]  }
  0x75   : > { %3624 = vmatprep.mubr.msk.f32.mxu0 %vm377_vm0, %v1287_v48  ;;  %3675 = vmatprep.subr.mxu0 %v3166_v49 }
  0x76   : > { %3676 = vmatpush3.msra.mxu0 %v3166_v49 }
  0x77   : > { %3706 = vmatmul.mubr.msk.f32.vlgmr.msra.gmra.mxu1 %vm377_vm0, %v1970_v50  ;;  %3625 = vmatmul.mubr.msk.f32.gmra.mxu0 %vm377_vm0, %v1288_v51 }
  0x78   : > { %3729 = vmatprep.subr.mxu0 %v3203_v52  ;;  %3627 = vmatprep.mubr.msk.f32.mxu0 %vm377_vm0, %v1289_v53 }
  0x79   : > { %3708 = vmatprep.mubr.msk.f32.mxu1 %vm377_vm0, %v1971_v54 }
  0x7b   : > { %3709 = vmatmul.mubr.msk.f32.gmra.mxu1 %vm377_vm0, %v1972_v55  ;;  %3628 = vmatmul.mubr.msk.f32.gmra.mxu0 %vm377_vm0, %v1290_v56 }
  0x7c   : > { %3711 = vmatprep.mubr.msk.f32.mxu1 %vm377_vm0, %v1973_v57  ;;  %3630 = vmatprep.mubr.msk.f32.mxu0 %vm377_vm0, %v1291_v58 }
  0x7f   : > { %3712 = vmatmul.mubr.msk.f32.gmra.mxu1 %vm377_vm0, %v1974_v59  ;;  %3631 = vmatmul.mubr.msk.f32.gmra.mxu0 %vm377_vm0, %v1292_v60 }
  0x80   : > { %3714 = vmatprep.mubr.msk.f32.mxu1 %vm377_vm0, %v1975_v61  ;;  %3633 = vmatprep.mubr.msk.f32.mxu0 %vm377_vm0, %v1293_v62 }
  0x83   : > { %3715 = vmatmul.mubr.msk.f32.gmra.mxu1 %vm377_vm0, %v1976_v63  ;;  %3634 = vmatmul.mubr.msk.f32.gmra.mxu0 %vm377_vm0, %v1294_v0 }
  0x84   : > { %3717 = vmatprep.mubr.msk.f32.mxu1 %vm377_vm0, %v1977_v1  ;;  %3636 = vmatprep.mubr.msk.f32.mxu0 %vm377_vm0, %v1295_v2 }
  0x87   : > { %3718 = vmatmul.mubr.msk.f32.gmra.mxu1 %vm377_vm0, %v1978_v3  ;;  %3637 = vmatmul.mubr.msk.f32.gmra.mxu0 %vm377_vm0, %v1296_v4  ;;  %v4757_v4 = vmov 0  }
  0x88   : > { %3720 = vmatprep.mubr.msk.f32.mxu1 %vm377_vm0, %v1979_v5  ;;  %3639 = vmatprep.mubr.msk.f32.mxu0 %vm377_vm0, %v1297_v6 }
  0x8b   : > { %3721 = vmatmul.mubr.msk.f32.gmra.mxu1 %vm377_vm0, %v1980_v7  ;;  %3640 = vmatmul.mubr.msk.f32.gmra.mxu0 %vm377_vm0, %v1298_v8 }
  0x8c   : > { %3723 = vmatprep.mubr.msk.f32.mxu1 %vm377_vm0, %v1981_v9  ;;  %3642 = vmatprep.mubr.msk.f32.mxu0 %vm377_vm0, %v1299_v10 }
  0x8f   : > { %3724 = vmatmul.mubr.msk.f32.gmra.mxu1 %vm377_vm0, %v1982_v11  ;;  %3643 = vmatmul.mubr.msk.f32.gmra.mxu0 %vm377_vm0, %v1300_v12 }
  0x90   : > { %3726 = vmatprep.mubr.msk.f32.mxu1 %vm377_vm0, %v1983_v13  ;;  %3677 = vmatprep.mubr.msk.f32.mxu0 %vm377_vm0, %v4203_v28  ;;  %v2208_v28 = vld [vmem:[#allocation2 + $0x6e] sm:$0xff] }
  0x93   : > { %3727 = vmatmul.mubr.msk.f32.gmra.mxu1 %vm377_vm0, %v1984_v14  ;;  %3678 = vmatmul.mubr.msk.f32.vlgmr.msra.gmra.mxu0 %vm377_vm0, %v4210_v30  ;;  %v2210_v30 = vld [vmem:[#allocation2 + $0x7e] sm:$0xff] }
  0x94   : > { %3730 = vmatpush3.msra.mxu0 %v3203_v52  ;;  %3680 = vmatprep.mubr.msk.f32.mxu0 %vm377_vm0, %v4216_v31  ;;  %v2211_v31 = vld [vmem:[#allocation2 + $0x86] sm:$0xff] }
  0x95   : > { %3731 = vmatprep.subr.mxu0 %v3202_v15  ;;  %2565 = vmatprep.mubr.bf16.mxu1 %v4757_v4 }
  0x96   : > { %3732 = vmatpush3.msra.mxu0 %v3202_v15 }
  0x97   : > { %3681 = vmatmul.mubr.msk.f32.gmra.mxu0 %vm377_vm0, %v4225_v33  ;;  %v3850_v33 = vld [vmem:[%s4754_s4 + $0x10] ss:$8 sps:$4 sm:$0xff]  }
  0x98   : > { %3683 = vmatprep.mubr.msk.f32.mxu0 %vm377_vm0, %v4234_v34  ;;  %v3852_v34 = vld [vmem:[%s4754_s4 + $0x14] ss:$8 sps:$4 sm:$0xff]  }
  0x99   : > { %2545 = vmatprep.subr.bf16.mxu1 %v3852_v34 }
  0x9a   : > { %2546 = vmatpush1.bf16.msra.mxu1 %v3850_v33 }
  0x9b   : > { %3684 = vmatmul.mubr.msk.f32.gmra.mxu0 %vm377_vm0, %v4238_v35  ;;  %2547 = vmatprep.subr.bf16.mxu1 %v3855_v47 }
  0x9c   : > { %3686 = vmatprep.mubr.msk.f32.mxu0 %vm377_vm0, %v4246_v36 }
  0x9e   : > { %2548 = vmatpush1.bf16.msra.mxu1 %v3853_v46 }
  0x9f   : > { %3687 = vmatmul.mubr.msk.f32.gmra.mxu0 %vm377_vm0, %v4250_v37 }
  0xa0   : > { %3689 = vmatprep.mubr.msk.f32.mxu0 %vm377_vm0, %v4258_v38 }
  0xa3   : > { %3690 = vmatmul.mubr.msk.f32.gmra.mxu0 %vm377_vm0, %v4262_v39 }
  0xa4   : > { %3692 = vmatprep.mubr.msk.f32.mxu0 %vm377_vm0, %v4270_v40 }
  0xa7   : > { %3693 = vmatmul.mubr.msk.f32.gmra.mxu0 %vm377_vm0, %v4274_v41 }
  0xa8   : > { %3695 = vmatprep.mubr.msk.f32.mxu0 %vm377_vm0, %v4282_v42 }
  0xab   : > { %3696 = vmatmul.mubr.msk.f32.gmra.mxu0 %vm377_vm0, %v4285_v43 }
  0xac   : > { %3698 = vmatprep.mubr.msk.f32.mxu0 %vm377_vm0, %v4292_v45 }
  0xaf   : > { %3699 = vmatmul.mubr.msk.f32.gmra.mxu0 %vm377_vm0, %v1756_v16 }
  0xb0   : > { %3733 = vmatprep.mubr.msk.f32.mxu0 %vm377_vm0, %v2197_v17 }
  0xb3   : > { %3734 = vmatmul.mubr.msk.f32.vlgmr.msra.gmra.mxu0 %vm377_vm0, %v2198_v18 }
  0xb4   : > { %3736 = vmatprep.mubr.msk.f32.mxu0 %vm377_vm0, %v2199_v19 }
  0xb7   : > { %3737 = vmatmul.mubr.msk.f32.gmra.mxu0 %vm377_vm0, %v2200_v20 }
  0xb8   : > { %3739 = vmatprep.mubr.msk.f32.mxu0 %vm377_vm0, %v2201_v21 }
  0xbb   : > { %3740 = vmatmul.mubr.msk.f32.gmra.mxu0 %vm377_vm0, %v2202_v22 }
  0xbc   : > { %3742 = vmatprep.mubr.msk.f32.mxu0 %vm377_vm0, %v2203_v23 }
  0xbf   : > { %3743 = vmatmul.mubr.msk.f32.gmra.mxu0 %vm377_vm0, %v2204_v24 }
  0xc0   : > { %3745 = vmatprep.mubr.msk.f32.mxu0 %vm377_vm0, %v2205_v25 }
  0xc3   : > { %3746 = vmatmul.mubr.msk.f32.gmra.mxu0 %vm377_vm0, %v2206_v26 }
  0xc4   : > { %3748 = vmatprep.mubr.msk.f32.mxu0 %vm377_vm0, %v2207_v27 }
  0xc7   : > { %3749 = vmatmul.mubr.msk.f32.gmra.mxu0 %vm377_vm0, %v2208_v28 }
  0xc8   : > { %3751 = vmatprep.mubr.msk.f32.mxu0 %vm377_vm0, %v2209_v29 }
  0xcb   : > { %3752 = vmatmul.mubr.msk.f32.gmra.mxu0 %vm377_vm0, %v2210_v30 }
  0xcc   : > { %3754 = vmatprep.mubr.msk.f32.mxu0 %vm377_vm0, %v2211_v31 }
  0xcf   : > { %3755 = vmatmul.mubr.msk.f32.gmra.mxu0 %vm377_vm0, %v2212_v32 }
  0xe3   : > { %v3511_v35 = vpop.f32.mrf.mxu0 }
  0xe5   : > { %v557_v36 = vpop.f32.mrf.mxu0 }
  0xe7   : > { %v3551_v37 = vpop.f32.mrf.mxu1  ;;  %v3514_v38 = vpop.f32.mrf.mxu0 }
  0xe9   : > { %v790_v39 = vpop.f32.mrf.mxu1  ;;  %v567_v40 = vpop.f32.mrf.mxu0 }
  0xeb   : > { %v3554_v41 = vpop.f32.mrf.mxu1  ;;  %v3517_v42 = vpop.f32.mrf.mxu0 }
  0xed   : > { %v800_v43 = vpop.f32.mrf.mxu1  ;;  %v577_v44 = vpop.f32.mrf.mxu0 }
  0xef   : > { %v3557_v45 = vpop.f32.mrf.mxu1  ;;  %v3520_v48 = vpop.f32.mrf.mxu0 }
  0xf1   : > { %v810_v49 = vpop.f32.mrf.mxu1  ;;  %v587_v50 = vpop.f32.mrf.mxu0 }
  0xf3   : > { %v3560_v51 = vpop.f32.mrf.mxu1  ;;  %v3523_v52 = vpop.f32.mrf.mxu0 }
  0xf4   : > { %v4396_v53 = vadd.f32 %v3551_v37, %v3523_v52 }
  0xf5   : > { %v820_v54 = vpop.f32.mrf.mxu1  ;;  %v597_v55 = vpop.f32.mrf.mxu0 }
  0xf6   : > { %v4398_v56 = vadd.f32 %v790_v39, %v597_v55 }
  0xf7   : > { %v4400_v57 = vpop.f32.mrf.mxu1  ;;  %v3526_v58 = vpop.f32.mrf.mxu0 }
  0xf8   : > { %v4402_v59 = vadd.f32 %v3554_v41, %v3526_v58 }
  0xf9   : > { %v4404_v60 = vpop.f32.mrf.mxu1  ;;  %v607_v61 = vpop.f32.mrf.mxu0 }
  0xfa   : > { %v4406_v62 = vadd.f32 %v800_v43, %v607_v61 }
  0xfb   : > { %v4408_v63 = vpop.f32.mrf.mxu1  ;;  %v3529_v0 = vpop.f32.mrf.mxu0 }
  0xfc   : > { %v4410_v1 = vadd.f32 %v3557_v45, %v3529_v0 }
  0xfd   : > { %v4412_v2 = vpop.f32.mrf.mxu1  ;;  %v617_v3 = vpop.f32.mrf.mxu0 }
  0xfe   : > { %v4415_v5 = vadd.f32 %v810_v49, %v617_v3 }
  0xff   : > { %v3601_v6 = vpop.f32.mrf.mxu1  ;;  %v3532_v7 = vpop.f32.mrf.mxu0 }
 0x100   : > { %v4417_v8 = vadd.f32 %v3560_v51, %v3532_v7 }
 0x101   : > { %v1210_v9 = vpop.f32.mrf.mxu1  ;;  %v627_v10 = vpop.f32.mrf.mxu0 }
 0x102   : > { %v4419_v11 = vadd.f32 %v820_v54, %v627_v10 }
 0x103   : > { %v3604_v12 = vpop.f32.mrf.mxu1  ;;  %v3539_v13 = vpop.f32.mrf.mxu0 }
 0x104   : > { %v756_v14 = vadd.f32 %v3539_v13, %v3511_v35 }
 0x105   : > { %v1220_v15 = vpop.f32.mrf.mxu1  ;;  %v750_v16 = vpop.f32.mrf.mxu0 }
 0x106   : > { %v751_v17 = vadd.f32 %v750_v16, %v557_v36 }
 0x107   : > { %v3607_v18 = vpop.f32.mrf.mxu1  ;;  %v3542_v19 = vpop.f32.mrf.mxu0 }
 0x108   : > { %v766_v20 = vadd.f32 %v3542_v19, %v3514_v38 }
 0x109   : > { %v1230_v21 = vpop.f32.mrf.mxu1  ;;  %v760_v22 = vpop.f32.mrf.mxu0 }
 0x10a   : > { %v761_v23 = vadd.f32 %v760_v22, %v567_v40 }
 0x10b   : > { %v3610_v24 = vpop.f32.mrf.mxu1  ;;  %v3545_v25 = vpop.f32.mrf.mxu0 }
 0x10c   : > { %v776_v26 = vadd.f32 %v3545_v25, %v3517_v42 }
 0x10d   : > { %v1240_v27 = vpop.f32.mrf.mxu1  ;;  %v770_v28 = vpop.f32.mrf.mxu0 }
 0x10e   : > { %v771_v29 = vadd.f32 %v770_v28, %v577_v44 }
 0x10f   : > { %v3613_v30 = vpop.f32.mrf.mxu1  ;;  %v3548_v31 = vpop.f32.mrf.mxu0 }
 0x110   : > { %v786_v32 = vadd.f32 %v3548_v31, %v3520_v48 }
 0x111   : > { %v1250_v33 = vpop.f32.mrf.mxu1  ;;  %v780_v34 = vpop.f32.mrf.mxu0 }
 0x112   : > { %v781_v35 = vadd.f32 %v780_v34, %v587_v50 }
 0x113   : > { %v3616_v37 = vpop.f32.mrf.mxu1  ;;  %v3567_v36 = vpop.f32.mrf.mxu0 }
 0x114   : > { %v4421_v39 = vadd.f32 %v3567_v36, %v756_v14 }
 0x115   : > { %v1260_v38 = vpop.f32.mrf.mxu1  ;;  %v962_v41 = vpop.f32.mrf.mxu0 }
 0x116   : > { %v4423_v43 = vadd.f32 %v962_v41, %v751_v17 }
 0x117   : > { %v4425_v40 = vpop.f32.mrf.mxu1  ;;  %v3570_v42 = vpop.f32.mrf.mxu0 }
 0x118   : > { %v4427_v45 = vadd.f32 %v3570_v42, %v766_v20 }
 0x119   : > { %v4429_v44 = vpop.f32.mrf.mxu1  ;;  %v972_v46 = vpop.f32.mrf.mxu0 }
 0x11a   : > { %v4431_v47 = vadd.f32 %v972_v46, %v761_v23 }
 0x11b   : > { %v4433_v48 = vpop.f32.mrf.mxu1  ;;  %v3573_v49 = vpop.f32.mrf.mxu0 }
 0x11c   : > { %v1046_v50 = vadd.f32 %v3573_v49, %v776_v26 }
 0x11d   : > { %v982_v51 = vpop.f32.mrf.mxu0  ;;  %v4435_v52 = vpop.f32.mrf.mxu1 }
 0x11e   : > { %v1045_v54 = vadd.f32 %v982_v51, %v771_v29  ;;  %v1274_v55 = vadd.f32 %v3601_v6, %v1046_v50 }
 0x11f   : > { %v3576_v58 = vpop.f32.mrf.mxu0  ;;  %v4437_v7 = vpop.f32.mrf.mxu1 }
 0x120   : > { %v1048_v61 = vadd.f32 %v3576_v58, %v786_v32  ;;  %v1273_v0 = vadd.f32 %v1210_v9, %v1045_v54 }
 0x121   : > { %v992_v3 = vpop.f32.mrf.mxu0  ;;  %v4440_v20 = vpop.f32.mrf.mxu1 }
 0x122   : > { %v1047_v10 = vadd.f32 %v992_v3, %v781_v35  ;;  %v1276_v13 = vadd.f32 %v3604_v12, %v1048_v61 }
 0x123   : > { %v3579_v14 = vpop.f32.mrf.mxu0  ;;  %v4444_v28 = vpop.f32.mrf.mxu1 }
 0x124   : > { %v1050_v16 = vadd.f32 %v3579_v14, %v4396_v53  ;;  %v1275_v17 = vadd.f32 %v1220_v15, %v1047_v10 }
 0x125   : > { %v1002_v19 = vpop.f32.mrf.mxu0  ;;  %v4448_v34 = vpop.f32.mrf.mxu1 }
 0x126   : > { %v1049_v22 = vadd.f32 %v1002_v19, %v4398_v56  ;;  %v1278_v23 = vadd.f32 %v3607_v18, %v1050_v16 }
 0x127   : > { %v3582_v25 = vpop.f32.mrf.mxu0  ;;  %v4452_v41 = vpop.f32.mrf.mxu1 }
 0x128   : > { %v1052_v6 = vadd.f32 %v3582_v25, %v4402_v59  ;;  %v1277_v26 = vadd.f32 %v1230_v21, %v1049_v22 }
 0x129   : > { %v1012_v9 = vpop.f32.mrf.mxu0 }
 0x12a   : > { %v1051_v29 = vadd.f32 %v1012_v9, %v4406_v62  ;;  %v1280_v12 = vadd.f32 %v3610_v24, %v1052_v6 }
 0x12b   : > { %v3585_v31 = vpop.f32.mrf.mxu0 }
 0x12c   : > { %v1054_v53 = vadd.f32 %v3585_v31, %v4410_v1  ;;  %v1279_v15 = vadd.f32 %v1240_v27, %v1051_v29  ;;  %v4455_v27 = vpop.f32.mrf.mxu1 }
 0x12d   : > { %v1022_v32 = vpop.f32.mrf.mxu0 }
 0x12e   : > { %v1053_v56 = vadd.f32 %v1022_v32, %v4415_v5  ;;  %v1282_v18 = vadd.f32 %v3613_v30, %v1054_v53  ;;  %v4457_v51 = vpop.f32.mrf.mxu1 }
 0x12f   : > { %v3588_v35 = vpop.f32.mrf.mxu0 }
 0x130   : > { %v1056_v59 = vadd.f32 %v3588_v35, %v4417_v8  ;;  %v1281_v21 = vadd.f32 %v1250_v33, %v1053_v56  ;;  %v4461_v33 = vpop.f32.mrf.mxu1 }
 0x131   : > { %v1032_v36 = vpop.f32.mrf.mxu0 }
 0x132   : > { %v1055_v62 = vadd.f32 %v1032_v36, %v4419_v11  ;;  %v1284_v24 = vadd.f32 %v3616_v37, %v1056_v59 }
 0x133   : > { %v3623_v42 = vpop.f32.mrf.mxu0 }
 0x134   : > { %v1283_v46 = vadd.f32 %v1260_v38, %v1055_v62  ;;  %v4467_v38 = vpop.f32.mrf.mxu1 }
 0x135   : > { %v1418_v1 = vpop.f32.mrf.mxu0 }
 0x136   : > { %v4473_v16 = vpop.f32.mrf.mxu1 }
 0x137   : > { %v3626_v49 = vpop.f32.mrf.mxu0 }
 0x138   : > { %v4479_v25 = vpop.f32.mrf.mxu1 }
 0x139   : > { %v1428_v50 = vpop.f32.mrf.mxu0  ;;  %4761 = vst [vmem:[#allocation4_spill] sm:$0xff] %v4479_v25 }
 0x13a   : > { %v4485_v29 = vpop.f32.mrf.mxu1 }
 0x13b   : > { %v3629_v5 = vpop.f32.mrf.mxu0  ;;  %4762 = vst [vmem:[#allocation5_spill] sm:$0xff] %v4485_v29 }
 0x13c   : > { %v4459_v30 = vadd.f32 %v3629_v5, %v1274_v55  ;;  %v3707_v32 = vpop.f32.mrf.mxu1 }
 0x13d   : > { %v1438_v8 = vpop.f32.mrf.mxu0 }
 0x13e   : > { %v4463_v54 = vadd.f32 %v1438_v8, %v1273_v0  ;;  %v2102_v59 = vpop.f32.mrf.mxu1 }
 0x13f   : > { %v3632_v58 = vpop.f32.mrf.mxu0 }
 0x140   : > { %v4465_v11 = vadd.f32 %v3632_v58, %v1276_v13  ;;  %v3710_v62 = vpop.f32.mrf.mxu1 }
 0x141   : > { %v1448_v37 = vpop.f32.mrf.mxu0 }
 0x142   : > { %v4469_v61 = vadd.f32 %v1448_v37, %v1275_v17  ;;  %v2112_v5 = vpop.f32.mrf.mxu1 }
 0x143   : > { %v3635_v3 = vpop.f32.mrf.mxu0 }
 0x144   : > { %v4471_v10 = vadd.f32 %v3635_v3, %v1278_v23  ;;  %v3713_v37 = vpop.f32.mrf.mxu1 }
 0x145   : > { %v1458_v14 = vpop.f32.mrf.mxu0 }
 0x146   : > { %v4475_v55 = vadd.f32 %v1458_v14, %v1277_v26 }
 0x147   : > { %v3638_v19 = vpop.f32.mrf.mxu0 }
 0x148   : > { %v4477_v22 = vadd.f32 %v3638_v19, %v1280_v12 }
 0x149   : > { %v1468_v0 = vpop.f32.mrf.mxu0 }
 0x14a   : > { %v4481_v13 = vadd.f32 %v1468_v0, %v1279_v15  ;;  %v1269_v0 = vadd.f32 %v4404_v60, %v4423_v43 }
 0x14b   : > { %v3641_v6 = vpop.f32.mrf.mxu0 }
 0x14c   : > { %v4483_v9 = vadd.f32 %v3641_v6, %v1282_v18  ;;  %v1497_v4 = vadd.f32 %v1418_v1, %v1269_v0 }
 0x14d   : > { %v1478_v17 = vpop.f32.mrf.mxu0 }
 0x14e   : > { %v4487_v23 = vadd.f32 %v1478_v17, %v1281_v21  ;;  %v1725_v60 = vadd.f32 %v4429_v44, %v1497_v4  ;;  %v4528_v4 = vld [vmem:[%s4753_s3] ss:$0 sm:$0xff] }
 0x14f   : > { %v3644_v31 = vpop.f32.mrf.mxu0 }
 0x150   : > { %v4489_v53 = vadd.f32 %v3644_v31, %v1284_v24  ;;  %v2122_v24 = vpop.f32.mrf.mxu1 }
 0x151   : > { %v1488_v26 = vpop.f32.mrf.mxu0 }
 0x152   : > { %4763 = vst [vmem:[#allocation6_spill] sm:$0xff] %v4489_v53  ;;  %v4491_v12 = vadd.f32 %v1488_v26, %v1283_v46  ;;  %v1270_v46 = vadd.f32 %v4400_v57, %v4421_v39  ;;  %v3716_v17 = vpop.f32.mrf.mxu1  ;;  %v1272_v26 = vadd.f32 %v4408_v63, %v4427_v45 }
 0x153   : > { %v3679_v56 = vpop.f32.mrf.mxu0 }
 0x154   : > { %4764 = vst [vmem:[#allocation7_spill] sm:$0xff] %v4491_v12  ;;  %v1498_v6 = vadd.f32 %v3623_v42, %v1270_v46  ;;  %v1271_v12 = vadd.f32 %v4412_v2, %v4431_v47  ;;  %v1500_v39 = vadd.f32 %v3626_v49, %v1272_v26  ;;  %v4512_v25 = vpop.f32.mrf.mxu1  ;;  %v1730_v49 = vadd.f32 %v4437_v7, %v4459_v30 }
 0x155   : > { %v1874_v35 = vpop.f32.mrf.mxu0  ;;  %v1732_v7 = vadd.f32 %v4444_v28, %v4465_v11  ;;  %v1734_v28 = vadd.f32 %v4452_v41, %v4471_v10 }
 0x156   : > { %v1726_v57 = vadd.f32 %v4425_v40, %v1498_v6  ;;  %v1499_v43 = vadd.f32 %v1428_v50, %v1271_v12  ;;  %v1728_v63 = vadd.f32 %v4433_v48, %v1500_v39  ;;  %v1953_v45 = vadd.f32 %v1874_v35, %v1725_v60  ;;  %v3719_v1 = vpop.f32.mrf.mxu1 }
 0x157   : > { %v3682_v15 = vpop.f32.mrf.mxu0  ;;  %v1729_v12 = vadd.f32 %v4440_v20, %v4463_v54  ;;  %v1731_v60 = vadd.f32 %v4448_v34, %v4469_v61  ;;  %v1733_v61 = vadd.f32 %v4455_v27, %v4475_v55 }
 0x158   : > { %v1954_v42 = vadd.f32 %v3679_v56, %v1726_v57  ;;  %v1727_v2 = vadd.f32 %v4435_v52, %v1499_v43  ;;  %v1956_v47 = vadd.f32 %v3682_v15, %v1728_v63  ;;  %v2181_v44 = vadd.f32 %v2102_v59, %v1953_v45  ;;  %v2142_v35 = vpop.f32.mrf.mxu1 }
 0x159   : > { %v1884_v36 = vpop.f32.mrf.mxu0 }
 0x15a   : > { %v2182_v40 = vadd.f32 %v3707_v32, %v1954_v42  ;;  %v1955_v50 = vadd.f32 %v1884_v36, %v1727_v2  ;;  %v2184_v32 = vadd.f32 %v3710_v62, %v1956_v47 }
 0x15b   : > { %v3685_v18 = vpop.f32.mrf.mxu0 }
 0x15c   : > { %v1958_v56 = vadd.f32 %v3685_v18, %v1730_v49  ;;  %v2183_v39 = vadd.f32 %v2112_v5, %v1955_v50  ;;  %v3722_v18 = vpop.f32.mrf.mxu1 }
 0x15d   : > { %v1894_v8 = vpop.f32.mrf.mxu0 }
 0x15e   : > { %v1957_v30 = vadd.f32 %v1894_v8, %v1729_v12  ;;  %v2186_v20 = vadd.f32 %v3713_v37, %v1958_v56  ;;  %v2152_v47 = vpop.f32.mrf.mxu1  ;;  %v1735_v12 = vadd.f32 %v4461_v33, %v4481_v13 }
 0x15f   : > { %v3688_v58 = vpop.f32.mrf.mxu0 }
 0x160   : > { %v1960_v54 = vadd.f32 %v3688_v58, %v1732_v7  ;;  %v2185_v11 = vadd.f32 %v2122_v24, %v1957_v30 }
 0x161   : > { %v1904_v21 = vpop.f32.mrf.mxu0 }
 0x162   : > { %v1959_v8 = vadd.f32 %v1904_v21, %v1731_v60  ;;  %v2188_v58 = vadd.f32 %v3716_v17, %v1960_v54  ;;  %v1736_v21 = vadd.f32 %v4457_v51, %v4477_v22 }
 0x163   : > { %v4493_v3 = vpop.f32.mrf.mxu0 }
 0x164   : > { %v1962_v37 = vadd.f32 %v4493_v3, %v1734_v28  ;;  %v2187_v27 = vadd.f32 %v4512_v25, %v1959_v8  ;;  %v1738_v25 = vadd.f32 %v4467_v38, %v4483_v9 }
 0x165   : > { %v4495_v14 = vpop.f32.mrf.mxu0 }
 0x166   : > { %v1961_v24 = vadd.f32 %v4495_v14, %v1733_v61  ;;  %v2190_v56 = vadd.f32 %v3719_v1, %v1962_v37 }
 0x167   : > { %v4499_v19 = vpop.f32.mrf.mxu0 }
 0x168   : > { %v2189_v7 = vadd.f32 %v2142_v35, %v1961_v24  ;;  %v4767_v35 = vld [vmem:[#allocation4_spill] sm:$0xff] }
 0x169   : > { %v4503_v31 = vpop.f32.mrf.mxu0 }
 0x16b   : > { %v4507_v29 = vpop.f32.mrf.mxu0 }
 0x16d   : > { %v4514_v53 = vpop.f32.mrf.mxu0 }
 0x16f   : > { %v4517_v46 = vpop.f32.mrf.mxu0 }
 0x171   : > { %v4520_v0 = vpop.f32.mrf.mxu0 }
 0x173   : > { %v3735_v6 = vpop.f32.mrf.mxu0 }
 0x174   : > { %v2410_v48 = vadd.f32 %v3735_v6, %v2182_v40 }
 0x175   : > { %v2330_v52 = vpop.f32.mrf.mxu0 }
 0x176   : > { %v2433_v15 = vadd.f32 %v4528_v4, %v2410_v48  ;;  %v2409_v26 = vadd.f32 %v2330_v52, %v2181_v44  ;;  %v4765_v48 = vmov 0   ;;  %v1964_v52 = vadd.f32 %v4499_v19, %v1736_v21 }
 0x177   : > { %v3738_v57 = vpop.f32.mrf.mxu0  ;;  %v1737_v19 = vadd.f32 %v4473_v16, %v4487_v23 }
 0x178   : > { %v2432_v59 = vadd.f32 %v4528_v4, %v2409_v26  ;;  %v2412_v36 = vadd.f32 %v3738_v57, %v2184_v32  ;;  %v2449_v62 = vmax.f32 %v2433_v15, 0.0  ;;  %v3725_v32 = vpop.f32.mrf.mxu1  ;;  %v1963_v57 = vadd.f32 %v4503_v31, %v1735_v12  ;;  %v4766_v31 = vld [vmem:[#allocation6_spill] sm:$0xff] }
 0x179   : > { %v2340_v43 = vpop.f32.mrf.mxu0  ;;  %v2192_v1 = vadd.f32 %v3722_v18, %v1964_v52 }
 0x17a   : > { %v2448_v42 = vmax.f32 %v2432_v59, 0.0  ;;  %v2435_v63 = vadd.f32 %v4528_v4, %v2412_v36  ;;  %v2411_v45 = vadd.f32 %v2340_v43, %v2183_v39  ;;  %v1966_v59 = vadd.f32 %v4507_v29, %v1738_v25  ;;  %v2162_v36 = vpop.f32.mrf.mxu1 }
 0x17b   : > { %v3741_v5 = vpop.f32.mrf.mxu0  ;;  %v1740_v43 = vadd.f32 %v4767_v35, %v4766_v31  ;;  %v2191_v16 = vadd.f32 %v2152_v47, %v1963_v57 }
 0x17c   : > { %v2464_v2 = vpack.c.bf16 %v2449_v62, %v2448_v42  ;;  %v2434_v40 = vadd.f32 %v4528_v4, %v2411_v45  ;;  %v2414_v34 = vadd.f32 %v3741_v5, %v2186_v20  ;;  %v2451_v6 = vmax.f32 %v2435_v63, 0.0  ;;  %v4768_v63 = vld [vmem:[#allocation7_spill] sm:$0xff]  ;;  %v4769_v45 = vld [vmem:[#allocation5_spill] sm:$0xff]  ;;  %v3728_v8 = vpop.f32.mrf.mxu1 }
 0x17d   : > { %v2350_v49 = vpop.f32.mrf.mxu0  ;;  %v1965_v62 = vadd.f32 %v4514_v53, %v1737_v19  ;;  %v1739_v28 = vadd.f32 %v4769_v45, %v4768_v63  ;;  %v1968_v5 = vadd.f32 %v4517_v46, %v1740_v43 }
 0x17e   : > { %v2450_v44 = vmax.f32 %v2434_v40, 0.0  ;;  %v2437_v41 = vadd.f32 %v4528_v4, %v2414_v34  ;;  %v2413_v10 = vadd.f32 %v2350_v49, %v2185_v11  ;;  %3225 = vmatmul.mubr.msk.bf16.vlgmr.msra.gmra.mxu1 %vm2508_vm1, %v2464_v2  ;;  %v2194_v11 = vadd.f32 %v3725_v32, %v1966_v59 }
 0x17f   : > { %v3744_v50 = vpop.f32.mrf.mxu0  ;;  %2575 = vmatprep.mubr.bf16.mxu1 %v4765_v48  ;;  %v1967_v47 = vadd.f32 %v4520_v0, %v1739_v28 }
 0x180   : > { %v2465_v55 = vpack.c.bf16 %v2451_v6, %v2450_v44  ;;  %v2436_v3 = vadd.f32 %v4528_v4, %v2413_v10  ;;  %v2416_v17 = vadd.f32 %v3744_v50, %v2188_v58  ;;  %v2453_v51 = vmax.f32 %v2437_v41, 0.0  ;;  %v2172_v10 = vpop.f32.mrf.mxu1 }
 0x181   : > { %v2360_v15 = vpop.f32.mrf.mxu0  ;;  %v2193_v58 = vadd.f32 %v2162_v36, %v1965_v62  ;;  %v2196_v41 = vadd.f32 %v3728_v8, %v1968_v5 }
 0x182   : > { %v2452_v22 = vmax.f32 %v2436_v3, 0.0  ;;  %v2439_v14 = vadd.f32 %v4528_v4, %v2416_v17  ;;  %v2415_v26 = vadd.f32 %v2360_v15, %v2187_v27  ;;  %v2195_v3 = vadd.f32 %v2172_v10, %v1967_v47 }
 0x183   : > { %v3747_v30 = vpop.f32.mrf.mxu0 }
 0x184   : > { %v2466_v39 = vpack.c.bf16 %v2453_v51, %v2452_v22  ;;  %v2438_v33 = vadd.f32 %v4528_v4, %v2415_v26  ;;  %v2418_v13 = vadd.f32 %v3747_v30, %v2190_v56  ;;  %v2455_v20 = vmax.f32 %v2439_v14, 0.0 }
 0x185   : > { %v2370_v60 = vpop.f32.mrf.mxu0 }
 0x186   : > { %v2454_v54 = vmax.f32 %v2438_v33, 0.0  ;;  %v2441_v38 = vadd.f32 %v4528_v4, %v2418_v13  ;;  %v2417_v9 = vadd.f32 %v2370_v60, %v2189_v7  ;;  %3226 = vmatmul.mubr.msk.bf16.gmra.mxu1 %vm2508_vm1, %v2465_v55  ;;  %v2476_v33 = vld [vmem:[%s4755_s5] sm:$0x3] }
 0x187   : > { %v3750_v42 = vpop.f32.mrf.mxu0  ;;  %2585 = vmatprep.mubr.bf16.mxu1 %v4765_v48 }
 0x188   : > { %v2467_v23 = vpack.c.bf16 %v2455_v20, %v2454_v54  ;;  %v2440_v29 = vadd.f32 %v4528_v4, %v2417_v9  ;;  %v2420_v18 = vadd.f32 %v3750_v42, %v2192_v1  ;;  %v2457_v40 = vmax.f32 %v2441_v38, 0.0 }
 0x189   : > { %v2380_v2 = vpop.f32.mrf.mxu0 }
 0x18a   : > { %v2456_v34 = vmax.f32 %v2440_v29, 0.0  ;;  %v2443_v53 = vadd.f32 %v4528_v4, %v2420_v18  ;;  %v2419_v61 = vadd.f32 %v2380_v2, %v2191_v16 }
 0x18b   : > { %v3753_v37 = vpop.f32.mrf.mxu0 }
 0x18c   : > { %v2468_v49 = vpack.c.bf16 %v2457_v40, %v2456_v34  ;;  %v2442_v6 = vadd.f32 %v4528_v4, %v2419_v61  ;;  %v2422_v44 = vadd.f32 %v3753_v37, %v2194_v11  ;;  %v2459_v24 = vmax.f32 %v2443_v53, 0.0 }
 0x18d   : > { %v2390_v21 = vpop.f32.mrf.mxu0 }
 0x18e   : > { %v2458_v46 = vmax.f32 %v2442_v6, 0.0  ;;  %v2445_v50 = vadd.f32 %v4528_v4, %v2422_v44  ;;  %v2421_v27 = vadd.f32 %v2390_v21, %v2193_v58  ;;  %3227 = vmatmul.mubr.msk.bf16.gmra.mxu1 %vm2508_vm1, %v2466_v39 }
 0x18f   : > { %v3756_v55 = vpop.f32.mrf.mxu0  ;;  %2595 = vmatprep.mubr.bf16.mxu1 %v4765_v48 }
 0x190   : > { %v2469_v17 = vpack.c.bf16 %v2459_v24, %v2458_v46  ;;  %v2444_v0 = vadd.f32 %v4528_v4, %v2421_v27  ;;  %v2424_v12 = vadd.f32 %v3756_v55, %v2196_v41  ;;  %v2461_v52 = vmax.f32 %v2445_v50, 0.0 }
 0x191   : > { %v2400_v56 = vpop.f32.mrf.mxu0 }
 0x192   : > { %v2460_v32 = vmax.f32 %v2444_v0, 0.0  ;;  %v2447_v15 = vadd.f32 %v4528_v4, %v2424_v12  ;;  %v2423_v51 = vadd.f32 %v2400_v56, %v2195_v3 }
 0x194   : > { %v2470_v22 = vpack.c.bf16 %v2461_v52, %v2460_v32  ;;  %v2446_v14 = vadd.f32 %v4528_v4, %v2423_v51  ;;  %v2463_v26 = vmax.f32 %v2447_v15, 0.0  ;;  %v2478_v4 = vlaneseq }
 0x196   : > { %v2462_v25 = vmax.f32 %v2446_v14, 0.0  ;;  %3228 = vmatmul.mubr.msk.bf16.gmra.mxu1 %vm2508_vm1, %v2467_v23  ;;  %v2479_v30 = vshrl.u32 %v2478_v4, 7 }
 0x197   : > { %2605 = vmatprep.mubr.bf16.mxu1 %v4765_v48 }
 0x198   : > { %v2471_v7 = vpack.c.bf16 %v2463_v26, %v2462_v25  ;;  %v2480_v57 = vsub.s32 0, %v2479_v30  ;;  %v2484_v39 = vsub.s32 1, %v2479_v30 }
 0x19a   : > { %v4596_v13 = vrot.slane %v2476_v33, %v2480_v57  ;;  %v4598_v19 = vrot.slane %v2476_v33, %v2484_v39 }
 0x19e   : > { %3229 = vmatmul.mubr.msk.bf16.gmra.mxu1 %vm2508_vm1, %v2468_v49 }
 0x19f   : > { %2615 = vmatprep.mubr.bf16.mxu1 %v4765_v48 }
 0x1a6   : > { %3230 = vmatmul.mubr.msk.bf16.gmra.mxu1 %vm2508_vm1, %v2469_v17 }
 0x1a7   : > { %2625 = vmatprep.mubr.bf16.mxu1 %v4765_v48 }
 0x1ae   : > { %3231 = vmatmul.mubr.msk.bf16.gmra.mxu1 %vm2508_vm1, %v2470_v22 }
 0x1af   : > { %2635 = vmatprep.mubr.bf16.mxu1 %v4765_v48 }
 0x1b6   : > { %3232 = vmatmul.mubr.msk.bf16.gmra.mxu1 %vm2508_vm1, %v2471_v7 }
 0x23e   : > { %v2567_v1 = vpop.f32.mrf.mxu1 }
 0x23f   : > { %v2568_v48 = vadd.f32 %v2567_v1, %v4596_v13 }
 0x240   : > { %v2569_v59 = vpop.f32.mrf.mxu1 }
 0x241   : > { %v2570_v36 = vadd.f32 %v2569_v59, %v4598_v19 }
 0x242   : > { %v2571_v60 = vpop.f32.mrf.mxu1 }
 0x243   : > { %v3274_v20 = vpack.c.bf16 %v2570_v36, %v2568_v48  ;;  %v2572_v38 = vadd.f32 %v2571_v60, %v4596_v13 }
 0x244   : > { %v2573_v54 = vpop.f32.mrf.mxu1 }
 0x245   : > { %2742 = vst [vmem:[%s4602_s19] sm:$0xff] %v3274_v20  ;;  %v2574_v9 = vadd.f32 %v2573_v54, %v4598_v19 }
 0x246   : > { %v2577_v31 = vpop.f32.mrf.mxu1 }
 0x247   : > { %v3275_v35 = vpack.c.bf16 %v2574_v9, %v2572_v38  ;;  %v2578_v62 = vadd.f32 %v2577_v31, %v4596_v13 }
 0x248   : > { %v2579_v43 = vpop.f32.mrf.mxu1 }
 0x249   : > { %2743 = vst [vmem:[%s4602_s19 + $0x8] sm:$0xff] %v3275_v35  ;;  %v2580_v42 = vadd.f32 %v2579_v43, %v4598_v19 }
 0x24a   : > { %v2581_v16 = vpop.f32.mrf.mxu1 }
 0x24b   : > { %v3276_v23 = vpack.c.bf16 %v2580_v42, %v2578_v62  ;;  %v2582_v18 = vadd.f32 %v2581_v16, %v4596_v13 }
 0x24c   : > { %v2583_v29 = vpop.f32.mrf.mxu1 }
 0x24d   : > { %2744 = vst [vmem:[%s4602_s19 + $0x10] sm:$0xff] %v3276_v23  ;;  %v2584_v63 = vadd.f32 %v2583_v29, %v4598_v19 }
 0x24e   : > { %v2587_v45 = vpop.f32.mrf.mxu1 }
 0x24f   : > { %v3277_v28 = vpack.c.bf16 %v2584_v63, %v2582_v18  ;;  %v2588_v5 = vadd.f32 %v2587_v45, %v4596_v13 }
 0x250   : > { %v2589_v11 = vpop.f32.mrf.mxu1 }
 0x251   : > { %2745 = vst [vmem:[%s4602_s19 + $0x18] sm:$0xff] %v3277_v28  ;;  %v2590_v8 = vadd.f32 %v2589_v11, %v4598_v19 }
 0x252   : > { %v2591_v2 = vpop.f32.mrf.mxu1 }
 0x253   : > { %v3278_v40 = vpack.c.bf16 %v2590_v8, %v2588_v5  ;;  %v2592_v53 = vadd.f32 %v2591_v2, %v4596_v13 }
 0x254   : > { %v2593_v34 = vpop.f32.mrf.mxu1 }
 0x255   : > { %2746 = vst [vmem:[%s4602_s19 + $0x20] sm:$0xff] %v3278_v40  ;;  %v2594_v61 = vadd.f32 %v2593_v34, %v4598_v19 }
 0x256   : > { %v2597_v58 = vpop.f32.mrf.mxu1 }
 0x257   : > { %v3279_v37 = vpack.c.bf16 %v2594_v61, %v2592_v53  ;;  %v2598_v49 = vadd.f32 %v2597_v58, %v4596_v13 }
 0x258   : > { %v2599_v47 = vpop.f32.mrf.mxu1 }
 0x259   : > { %2747 = vst [vmem:[%s4602_s19 + $0x28] sm:$0xff] %v3279_v37  ;;  %v2600_v6 = vadd.f32 %v2599_v47, %v4598_v19 }
 0x25a   : > { %v2601_v44 = vpop.f32.mrf.mxu1 }
 0x25b   : > { %v3280_v41 = vpack.c.bf16 %v2600_v6, %v2598_v49  ;;  %v2602_v21 = vadd.f32 %v2601_v44, %v4596_v13 }
 0x25c   : > { %v2603_v10 = vpop.f32.mrf.mxu1 }
 0x25d   : > { %2748 = vst [vmem:[%s4602_s19 + $0x30] sm:$0xff] %v3280_v41  ;;  %v2604_v24 = vadd.f32 %v2603_v10, %v4598_v19 }
 0x25e   : > { %v2607_v46 = vpop.f32.mrf.mxu1 }
 0x25f   : > { %v3281_v50 = vpack.c.bf16 %v2604_v24, %v2602_v21  ;;  %v2608_v55 = vadd.f32 %v2607_v46, %v4596_v13 }
 0x260   : > { %v2609_v27 = vpop.f32.mrf.mxu1 }
 0x261   : > { %2749 = vst [vmem:[%s4602_s19 + $0x38] sm:$0xff] %v3281_v50  ;;  %v2610_v3 = vadd.f32 %v2609_v27, %v4598_v19 }
 0x262   : > { %v2611_v17 = vpop.f32.mrf.mxu1 }
 0x263   : > { %v3282_v0 = vpack.c.bf16 %v2610_v3, %v2608_v55  ;;  %v2612_v56 = vadd.f32 %v2611_v17, %v4596_v13 }
 0x264   : > { %v2613_v12 = vpop.f32.mrf.mxu1 }
 0x265   : > { %2750 = vst [vmem:[%s4602_s19 + $0x40] sm:$0xff] %v3282_v0  ;;  %v2614_v52 = vadd.f32 %v2613_v12, %v4598_v19 }
 0x266   : > { %v2617_v32 = vpop.f32.mrf.mxu1 }
 0x267   : > { %v3283_v15 = vpack.c.bf16 %v2614_v52, %v2612_v56  ;;  %v2618_v22 = vadd.f32 %v2617_v32, %v4596_v13 }
 0x268   : > { %v2619_v51 = vpop.f32.mrf.mxu1 }
 0x269   : > { %2751 = vst [vmem:[%s4602_s19 + $0x48] sm:$0xff] %v3283_v15  ;;  %v2620_v14 = vadd.f32 %v2619_v51, %v4598_v19 }
 0x26a   : > { %v2621_v26 = vpop.f32.mrf.mxu1 }
 0x26b   : > { %v3284_v25 = vpack.c.bf16 %v2620_v14, %v2618_v22  ;;  %v2622_v4 = vadd.f32 %v2621_v26, %v4596_v13 }
 0x26c   : > { %v2623_v7 = vpop.f32.mrf.mxu1 }
 0x26d   : > { %2752 = vst [vmem:[%s4602_s19 + $0x50] sm:$0xff] %v3284_v25  ;;  %v2624_v30 = vadd.f32 %v2623_v7, %v4598_v19 }
 0x26e   : > { %v2627_v57 = vpop.f32.mrf.mxu1 }
 0x26f   : > { %v3285_v39 = vpack.c.bf16 %v2624_v30, %v2622_v4  ;;  %v2628_v1 = vadd.f32 %v2627_v57, %v4596_v13 }
 0x270   : > { %v2629_v33 = vpop.f32.mrf.mxu1 }
 0x271   : > { %2753 = vst [vmem:[%s4602_s19 + $0x58] sm:$0xff] %v3285_v39  ;;  %v2630_v59 = vadd.f32 %v2629_v33, %v4598_v19 }
 0x272   : > { %v2631_v48 = vpop.f32.mrf.mxu1 }
 0x273   : > { %v3286_v36 = vpack.c.bf16 %v2630_v59, %v2628_v1  ;;  %v2632_v20 = vadd.f32 %v2631_v48, %v4596_v13 }
 0x274   : > { %v2633_v60 = vpop.f32.mrf.mxu1 }
 0x275   : > { %2754 = vst [vmem:[%s4602_s19 + $0x60] sm:$0xff] %v3286_v36  ;;  %v2634_v54 = vadd.f32 %v2633_v60, %v4598_v19 }
 0x276   : > { %v2637_v38 = vpop.f32.mrf.mxu1 }
 0x277   : > { %v3287_v9 = vpack.c.bf16 %v2634_v54, %v2632_v20  ;;  %v2638_v35 = vadd.f32 %v2637_v38, %v4596_v13 }
 0x278   : > { %v2639_v31 = vpop.f32.mrf.mxu1 }
 0x279   : > { %2755 = vst [vmem:[%s4602_s19 + $0x68] sm:$0xff] %v3287_v9  ;;  %v2640_v43 = vadd.f32 %v2639_v31, %v4598_v19 }
 0x27a   : > { %v2641_v62 = vpop.f32.mrf.mxu1 }
 0x27b   : > { %v3288_v42 = vpack.c.bf16 %v2640_v43, %v2638_v35  ;;  %v2642_v23 = vadd.f32 %v2641_v62, %v4596_v13 }
 0x27c   : > { %v2643_v16 = vpop.f32.mrf.mxu1 }
 0x27d   : > { %2756 = vst [vmem:[%s4602_s19 + $0x70] sm:$0xff] %v3288_v42  ;;  %v2644_v29 = vadd.f32 %v2643_v16, %v4598_v19  ;;  %2764 = sbr.rel (!%p4005_p4) target bundleno = 683 (0x2ab), region = 48 }
 0x27f   : > { %v3289_v18 = vpack.c.bf16 %v2644_v29, %v2642_v23 }
 0x281   : > { %2757 = vst [vmem:[%s4602_s19 + $0x78] sm:$0xff] %v3289_v18 }
 0x282   : > { %s4781_s21 = smov (!%p2767_p10, %s2766_s21), 16 }
 0x283   : > { %s3290_s30 = sshll.u32 %s4781_s21, 7 }
 0x284   : > { %p3256_p11 = scmp.eq.s32.totalorder %s3290_s30, 0 }
 0x285   : > { %s4663_s7 = sshrl.u32 (!%p3256_p11), %s4781_s21, 4 }
 0x286   : > { %2777 = sbr.rel (%p3256_p11) target bundleno = 683 (0x2ab), region = 52  ;;  %p3257_p12 = scmp.le.s32.totalorder (!%p3256_p11), %s4663_s7, 0 }
 0x28b   : > { %2998 = sbr.rel (%p3257_p12) target bundleno = 666 (0x29a), region = 139  ;;  %s4770_s24 = smov (!%p3257_p12), %s4657_s27 }
 0x28c   : > { %s4771_s29 = smov (!%p3257_p12), %s4602_s19  ;;  %s4672_s10 = smov (!%p3257_p12), 0  }
 0x28d   : > { %s4674_s8 = smov (!%p3257_p12), 0  }
 0x290 LB: >> { %v2870_v13 = vld [vmem:[%s3918_s29] sm:$0xff]  ;;  %v2872_v19 = vld [vmem:[%s3918_s29 + $0x8] sm:$0xff]  ;;  %v2874_v63 = vld [vmem:[%s3918_s29 + $0x10] sm:$0xff]  ;;  %s2902_s9 = sadd.s32 1, %s3922_s10  ;;  %s2864_s8 = sadd.s32 1, %s3926_s8   ;;  %s3926_s8 = sphi %s4674_s8, %s2864_s8   ;;  %s3922_s10 = sphi %s4672_s10, %s4772_s10   ;;  %s3918_s29 = sphi %s4771_s29, %s2907_s29   ;;  %s3914_s24 = sphi %s4770_s24, %s2908_s24  }
 0x291   : >> { %2871 = vst [vmem:[%s3914_s24] sm:$0xff] %v2870_v13  ;;  %2873 = vst [vmem:[%s3914_s24 + $0x8] sm:$0xff] %v2872_v19  ;;  %v2876_v45 = vld [vmem:[%s3918_s29 + $0x18] sm:$0xff]  ;;  %v2878_v28 = vld [vmem:[%s3918_s29 + $0x20] sm:$0xff]  ;;  %p2903_p13 = scmp.ge.s32.totalorder %s2902_s9, %s4663_s7  ;;  %p2863_p0 = scmp.ge.s32.totalorder %s2864_s8, %s4663_s7 }
 0x292   : >> { %2875 = vst [vmem:[%s3914_s24 + $0x10] sm:$0xff] %v2874_v63  ;;  %v2880_v11 = vld [vmem:[%s3918_s29 + $0x28] sm:$0xff]  ;;  %2877 = vst [vmem:[%s3914_s24 + $0x18] sm:$0xff] %v2876_v45  ;;  %v2882_v5 = vld [vmem:[%s3918_s29 + $0x30] sm:$0xff] }
 0x293   : >> { %2879 = vst [vmem:[%s3914_s24 + $0x20] sm:$0xff] %v2878_v28  ;;  %2881 = vst [vmem:[%s3914_s24 + $0x28] sm:$0xff] %v2880_v11  ;;  %v2884_v8 = vld [vmem:[%s3918_s29 + $0x38] sm:$0xff]  ;;  %v2886_v2 = vld [vmem:[%s3918_s29 + $0x40] sm:$0xff]  ;;  %s4783_s9 = smov (%p2903_p13, %s2902_s9), 0 }
 0x294   : >> { %2883 = vst [vmem:[%s3914_s24 + $0x30] sm:$0xff] %v2882_v5  ;;  %2885 = vst [vmem:[%s3914_s24 + $0x38] sm:$0xff] %v2884_v8  ;;  %v2888_v40 = vld [vmem:[%s3918_s29 + $0x48] sm:$0xff]  ;;  %v2890_v34 = vld [vmem:[%s3918_s29 + $0x50] sm:$0xff]  ;;  %s3258_s11 = sshll.u32 %s4783_s9, 7  ;;  %s4772_s10 = smov %s4783_s9 }
 0x295   : >> { %2887 = vst [vmem:[%s3914_s24 + $0x40] sm:$0xff] %v2886_v2  ;;  %v2892_v53 = vld [vmem:[%s3918_s29 + $0x58] sm:$0xff]  ;;  %2889 = vst [vmem:[%s3914_s24 + $0x48] sm:$0xff] %v2888_v40  ;;  %v2894_v61 = vld [vmem:[%s3918_s29 + $0x60] sm:$0xff]  ;;  %2866 = sbr.rel (!%p2863_p0) target bundleno = 656 (0x290), region = 145 }
 0x296   : >> { %2891 = vst [vmem:[%s3914_s24 + $0x50] sm:$0xff] %v2890_v34  ;;  %2893 = vst [vmem:[%s3914_s24 + $0x58] sm:$0xff] %v2892_v53  ;;  %v2896_v58 = vld [vmem:[%s3918_s29 + $0x68] sm:$0xff]  ;;  %v2898_v37 = vld [vmem:[%s3918_s29 + $0x70] sm:$0xff] }
 0x297   : >> { %2895 = vst [vmem:[%s3914_s24 + $0x60] sm:$0xff] %v2894_v61  ;;  %2897 = vst [vmem:[%s3914_s24 + $0x68] sm:$0xff] %v2896_v58  ;;  %v2900_v47 = vld [vmem:[%s3918_s29 + $0x78] sm:$0xff]  ;;  %s2907_s29 = scalar_lea.vmem %s4602_s19, %s3258_s11 [#allocation3]  }
 0x298   : >> { %2899 = vst [vmem:[%s3914_s24 + $0x70] sm:$0xff] %v2898_v37  ;;  %2901 = vst [vmem:[%s3914_s24 + $0x78] sm:$0xff] %v2900_v47  ;;  %s2908_s24 = scalar_lea.vmem %s4657_s27, %s3258_s11  }
 0x29a PF: > { %s4732_s12 = sand.u32 15, %s4781_s21   ;;  %s3293_s13 = sshll.u32 %s4663_s7, 7 }
 0x29b   : > { %s2913_s14 = scalar_lea.vmem %s4602_s19, %s3293_s13 [#allocation3]   ;;  %s2915_s15 = scalar_lea.vmem %s4657_s27, %s3293_s13  }
 0x29c   : > { %p3263_p1 = scmp.le.s32.totalorder %s4732_s12, 0 }
 0x29d   : > { %s3928_s16 = smov (!%p3263_p1), %s2915_s15   ;;  %s3932_s17 = smov (!%p3263_p1), %s2913_s14  }
 0x29e   : > { %3012 = sbr.rel (%p3263_p1) target bundleno = 683 (0x2ab), region = 150  ;;  %s3936_s18 = smov (!%p3263_p1), 0  }
 0x29f   : > { %s3940_s20 = smov (!%p3263_p1), 0  }
 0x2a3 LB: >> { %v2925_v49 = vld [vmem:[%s3934_s17] sm:$0xff]  ;;  %s2927_s21 = sadd.s32 1, %s3938_s18  ;;  %s2919_s20 = sadd.s32 1, %s3942_s20   ;;  %s3942_s20 = sphi %s3940_s20, %s2919_s20   ;;  %s3938_s18 = sphi %s3936_s18, %s3937_s18   ;;  %s3934_s17 = sphi %s3932_s17, %s2932_s17   ;;  %s3930_s16 = sphi %s3928_s16, %s2933_s16  }
 0x2a4   : >> { %2926 = vst [vmem:[%s3930_s16] sm:$0xff] %v2925_v49  ;;  %p2928_p2 = scmp.ge.s32.totalorder %s2927_s21, %s4732_s12  ;;  %p2918_p3 = scmp.ge.s32.totalorder %s2919_s20, %s4732_s12 }
 0x2a6   : >> { %s4785_s21 = smov (%p2928_p2, %s2927_s21), 0  ;;  %2921 = sbr.rel (!%p2918_p3) target bundleno = 675 (0x2a3), region = 156 }
 0x2a7   : >> { %s3264_s19 = sshll.u32 %s4785_s21, 3  ;;  %s3937_s18 = smov %s4785_s21  }
 0x2a8   : >> { %s2932_s17 = scalar_lea.vmem %s2913_s14, %s3264_s19 [#allocation3]   ;;  %s2933_s16 = scalar_lea.vmem %s2915_s15, %s3264_s19  }
 0x2ab PF: > { %p13_p4 = scmp.ge.s32.totalorder %s3995_s25, 4   ;;  %s4773_s21 = smov %s3906_s22 }
 0x2ac   : > { %s4774_s22 = smov %s4003_s28  ;;  %s4775_s23 = smov %s3995_s25 }
 0x2ad   :  { %15 = sbr.rel (!%p13_p4) target bundleno = 2 (0x2), region = 167 }

</bundles_post_ra>
